<compile_context>
chip_gen: v7x
topology: tpu7x:2x2x1
jax: 0.10.0
libtpu: 0.0.40
codegen_flags: <defaults>
</compile_context>

<pallas_src>
import functools
from collections import OrderedDict
from math import sqrt

import jax
import jax.numpy as jnp
from jax.experimental import pallas as pl
from jax.experimental.pallas import tpu as pltpu


# ------------------------------ hardware query -------------------------------
def _vmem_capacity_bytes():
    """Best-effort per-core VMEM capacity; conservative (v7x, 64 MiB) if unknown."""
    try:
        cap = getattr(pltpu.get_tpu_info(), "vmem_capacity_bytes", None)
        if cap:
            return int(cap)
    except Exception:
        pass
    try:
        kind = jax.devices()[0].device_kind.lower()
        if ("v4" in kind) or ("v5" in kind) or ("v6" in kind):
            return 128 * 1024 * 1024
    except Exception:
        pass
    return 64 * 1024 * 1024


def _bf16_exp_ok():
    """bf16 EUP exp exists on v6e/v7x; keep f32 exp elsewhere (v5e has no bf16 EUP)."""
    try:
        kind = jax.devices()[0].device_kind.lower()
        return ("v6" in kind) or ("v7" in kind)
    except Exception:
        return False


# ---------------------------------- kernel -----------------------------------
def _fused_stream_kernel(n_heads, g_items, seq_len, d_model, kv_tile,
                         compute_dtype, exp_dtype, approx_recip,
                         x_ref, wq_ref, wk_ref, wv_ref, bq_ref, bk_ref, bv_ref,
                         we_ref, be_ref, wo_ref, bo_ref,
                         o_ref, *kv_scratch):
    dh = d_model // n_heads
    use_flash = kv_tile < seq_len

    def per_item(g, carry):
        # Input stays f32 in HBM; cast to the compute dtype in-kernel.
        x = x_ref[g].astype(compute_dtype)                        # (S, D)
        # QKV projections (1/sqrt(dh) folded into wq/bq); f32 MXU accumulation.
        q = (jnp.dot(x, wq_ref[...], preferred_element_type=jnp.float32)
             + bq_ref[...]).astype(compute_dtype)
        k = (jnp.dot(x, wk_ref[...], preferred_element_type=jnp.float32)
             + bk_ref[...]).astype(compute_dtype)
        v = (jnp.dot(x, wv_ref[...], preferred_element_type=jnp.float32)
             + bv_ref[...]).astype(compute_dtype)

        if use_flash:
            k_scr, v_scr = kv_scratch
            k_scr[...] = k                                        # lane-dense stores
            v_scr[...] = v

        # Folded output-projection accumulators (wout already folded into
        # we/wo); each head accumulates directly -> no head scratch, no
        # masked dh-wide stores.
        acc_e = jnp.zeros((seq_len, d_model), jnp.float32)
        acc_o = jnp.zeros((seq_len, d_model), jnp.float32)

        for h in range(n_heads):                                  # short static unroll
            lo = h * dh
            q_h = q[:, lo:lo + dh]

            if not use_flash:
                k_h = k[:, lo:lo + dh]
                v_h = v[:, lo:lo + dh]
                logits = jax.lax.dot_general(
                    q_h, k_h, (((1,), (1,)), ((), ())),
                    preferred_element_type=jnp.float32)           # (S, S)
                m = jnp.max(logits, axis=-1, keepdims=True)
                e = jnp.exp((logits - m).astype(exp_dtype))
                denom = jnp.sum(e.astype(jnp.float32), axis=-1, keepdims=True)
                o_h = jnp.dot(e.astype(compute_dtype), v_h,
                              preferred_element_type=jnp.float32)
                o_h = o_h * pl.reciprocal(denom, approx=approx_recip)
            else:
                # Online-softmax over KV chunks: working set O(S * kv_tile).
                def chunk(c, st):
                    m_i, l_i, acc = st
                    start = pl.multiple_of(c * kv_tile, kv_tile)
                    k_c = k_scr[pl.ds(start, kv_tile), pl.ds(lo, dh)]
                    v_c = v_scr[pl.ds(start, kv_tile), pl.ds(lo, dh)]
                    logits = jax.lax.dot_general(
                        q_h, k_c, (((1,), (1,)), ((), ())),
                        preferred_element_type=jnp.float32)       # (S, kv_tile)
                    m_new = jnp.maximum(m_i, jnp.max(logits, axis=-1, keepdims=True))
                    alpha = jnp.exp(m_i - m_new)
                    p = jnp.exp((logits - m_new).astype(exp_dtype))
                    l_new = alpha * l_i + jnp.sum(p.astype(jnp.float32),
                                                  axis=-1, keepdims=True)
                    acc_new = alpha * acc + jnp.dot(
                        p.astype(compute_dtype), v_c,
                        preferred_element_type=jnp.float32)
                    return m_new, l_new, acc_new

                m0 = jnp.full((seq_len, 1), -jnp.inf, jnp.float32)
                l0 = jnp.zeros((seq_len, 1), jnp.float32)
                a0 = jnp.zeros((seq_len, dh), jnp.float32)
                _, l_f, acc_f = jax.lax.fori_loop(
                    0, seq_len // kv_tile, chunk, (m0, l0, a0))
                o_h = acc_f * pl.reciprocal(l_f, approx=approx_recip)

            o_h = o_h.astype(compute_dtype)
            # Accumulate the head straight into the folded even/odd upscale
            # projections (replaces head_scratch + the separate wout matmul).
            acc_e = acc_e + jnp.dot(o_h, we_ref[lo:lo + dh, :],
                                    preferred_element_type=jnp.float32)
            acc_o = acc_o + jnp.dot(o_h, wo_ref[lo:lo + dh, :],
                                    preferred_element_type=jnp.float32)

        # (output Linear + upscale Linear) -> ReLU -> MaxPool1d(2, 2) ==
        # max(relu(even columns), relu(odd columns)).
        up_e = acc_e + be_ref[...]
        up_o = acc_o + bo_ref[...]
        pooled = jnp.maximum(jnp.maximum(up_e, 0.0), jnp.maximum(up_o, 0.0))
        o_ref[g] = pooled.astype(o_ref.dtype)
        return carry

    jax.lax.fori_loop(0, g_items, per_item, 0)


# ------------------------------ sizing helpers --------------------------------
def _vmem_bytes_per_step(g, s, d, act_itemsize, kv_tile):
    io = (2 + 2) * g * s * d * 4                      # f32 in/out blocks, double-buffered
    weights = 5 * d * d * act_itemsize + 5 * d * 4    # single-buffered weights + f32 biases
    qkv = 3 * s * d * (4 + act_itemsize)              # q/k/v f32 accum + compute-dtype copies
    attn = 2 * s * kv_tile * 4 + 4 * s * 4            # logits/exp tile + running stats
    accs = 2 * s * d * 4                              # folded-projection accumulators
    kv_scr = 2 * s * d * act_itemsize if kv_tile < s else 0
    return io + weights + qkv + attn + accs + kv_scr


def _pick_group_block(n_items, s, d, act_itemsize, kv_tile, budget):
    """Largest divisor of n_items (<= 8) fitting `budget`, preferring an even
    grid-step count (balances v7x's two TensorCores) and >= 2 steps (pipelining)."""
    best_g, best_key = 1, None
    for g in range(1, min(n_items, 8) + 1):
        if n_items % g:
            continue
        if _vmem_bytes_per_step(g, s, d, act_itemsize, kv_tile) > budget:
            continue
        steps = n_items // g
        key = (steps % 2 == 0, steps >= 2, g)
        if best_key is None or key > best_key:
            best_g, best_key = g, key
    return best_g


def _pick_kv_tile(s):
    # Full-S softmax while the per-head (S, S) f32 logits tile is small;
    # otherwise flash-style KV chunks (working set O(S * kv_tile)).
    if s * s * 4 <= 2 * 1024 * 1024:
        return s
    for t in (1024, 512, 256, 128):
        if s % t == 0:
            return t
    return s   # TODO(synk): ragged S -> pad/mask a KV tile instead of full softmax


# ------------------------------ weight preparation ----------------------------
def prepare_stream_params(params, n_heads, compute_dtype=jnp.bfloat16):
    """Repack PyTorch-layout params for one head count (do ONCE per params /
    compute_dtype and reuse across forwards):
      * qkv split into per-head-contiguous Wq/Wk/Wv; 1/sqrt(dh) folded into Wq/bq,
      * output Linear folded into the even/odd upscale columns (composed in f32
        at HIGHEST precision, then cast to the compute dtype)."""
    d_model = params["wout"].shape[0]
    assert d_model % n_heads == 0, "d_model must be divisible by the head count"
    dh = d_model // n_heads
    scale = 1.0 / sqrt(dh)

    w = params["wqkv"].reshape(d_model, n_heads, 3, dh)
    b = params["bqkv"].reshape(n_heads, 3, dh)
    wq = (w[:, :, 0, :].reshape(d_model, d_model) * scale).astype(compute_dtype)
    wk = w[:, :, 1, :].reshape(d_model, d_model).astype(compute_dtype)
    wv = w[:, :, 2, :].reshape(d_model, d_model).astype(compute_dtype)
    bq = (b[:, 0, :].reshape(1, d_model) * scale).astype(jnp.float32)
    bk = b[:, 1, :].reshape(1, d_model).astype(jnp.float32)
    bv = b[:, 2, :].reshape(1, d_model).astype(jnp.float32)

    hi = jax.lax.Precision.HIGHEST
    wout = params["wout"].astype(jnp.float32)
    bout = params["bout"].reshape(1, d_model).astype(jnp.float32)
    wup_e = params["wup"][:, 0::2].astype(jnp.float32)
    wup_o = params["wup"][:, 1::2].astype(jnp.float32)
    bup_e = params["bup"][0::2].reshape(1, d_model).astype(jnp.float32)
    bup_o = params["bup"][1::2].reshape(1, d_model).astype(jnp.float32)
    we = jnp.dot(wout, wup_e, precision=hi).astype(compute_dtype)
    wo = jnp.dot(wout, wup_o, precision=hi).astype(compute_dtype)
    be = (jnp.dot(bout, wup_e, precision=hi) + bup_e).astype(jnp.float32)
    bo = (jnp.dot(bout, wup_o, precision=hi) + bup_o).astype(jnp.float32)
    return (wq, wk, wv, bq, bk, bv, we, be, wo, bo)


def prepare_knowledge_params(params, head_counts, compute_dtype=jnp.bfloat16):
    """Precompute the repacked/folded weights once per distinct head count."""
    return {h: prepare_stream_params(params, h, compute_dtype)
            for h in sorted(set(head_counts))}


# ---------------------------------- wrapper -----------------------------------
def knowledge_streams_fused(x_stack, stream_weights, *, n_heads,
                            compute_dtype=jnp.bfloat16, kv_tile=None):
    """Attention + (folded output+upscale Linear) + ReLU + MaxPool1d(2,2) for a
    stack of stream-batch items (N, S, D) sharing one head count: ONE launch."""
    N, S, D = x_stack.shape
    assert D % n_heads == 0, "d_model must be divisible by the stream's head count"

    kv_tile = _pick_kv_tile(S) if kv_tile is None else min(int(kv_tile), S)
    assert S % kv_tile == 0, "kv_tile must divide the sequence length"
    use_flash = kv_tile < S

    capacity = _vmem_capacity_bytes()
    act_itemsize = jnp.dtype(compute_dtype).itemsize
    G = _pick_group_block(N, S, D, act_itemsize, kv_tile, int(0.45 * capacity))
    est = _vmem_bytes_per_step(G, S, D, act_itemsize, kv_tile)
    vmem_limit = int(min(max(2 * est, 32 * 1024 * 1024), int(0.8 * capacity)))

    approx_recip = jnp.dtype(compute_dtype) != jnp.dtype(jnp.float32)
    exp_dtype = compute_dtype if (approx_recip and _bf16_exp_ok()) else jnp.float32
    scratch = ([pltpu.VMEM((S, D), compute_dtype)] * 2) if use_flash else []

    def attempt(weight_buffers, exp_dt):
        kernel = functools.partial(_fused_stream_kernel, n_heads, G, S, D,
                                   kv_tile, compute_dtype, exp_dt, approx_recip)

        def w_spec(shape):
            if weight_buffers is None:
                return pl.BlockSpec(shape, lambda i: (0, 0))
            # Weights never change across grid steps -> drop the dead second
            # pipeline buffer (frees ~5*D*D*itemsize bytes of VMEM at large D).
            return pl.BlockSpec(shape, lambda i: (0, 0),
                                pipeline_mode=pl.Buffered(weight_buffers))

        return pl.pallas_call(
            kernel,
            out_shape=jax.ShapeDtypeStruct((N, S, D), jnp.float32),
            grid=(N // G,),
            in_specs=[
                pl.BlockSpec((G, S, D), lambda i: (i, 0, 0)),   # x stays f32 in HBM
                w_spec((D, D)), w_spec((D, D)), w_spec((D, D)),
                w_spec((1, D)), w_spec((1, D)), w_spec((1, D)),
                w_spec((D, D)), w_spec((1, D)),
                w_spec((D, D)), w_spec((1, D)),
            ],
            out_specs=pl.BlockSpec((G, S, D), lambda i: (i, 0, 0)),
            scratch_shapes=scratch,
            compiler_params=pltpu.CompilerParams(
                dimension_semantics=("parallel",),
                vmem_limit_bytes=vmem_limit),
        )(x_stack, *stream_weights)

    try:
        # Preferred configuration: single-buffered weights, bf16 exp (v6e/v7x).
        return attempt(1, exp_dtype)
    except Exception:
        # Fallback for lowerings without single-buffered specs / bf16 exp.
        return attempt(None, jnp.float32)


def init_params(key, d_model):
    """Deterministic synthetic init (shapes match the nn.Module).

    share_weights=False: the four qkv linears / four upscales are deepcopies of
    one another at __init__ (identical values) -> init once and reuse.  The
    output Linear is a single shared module."""
    ks = jax.random.split(key, 6)
    s = 1.0 / sqrt(d_model)
    return dict(
        wqkv=jax.random.uniform(ks[0], (d_model, 3 * d_model), jnp.float32, -s, s),
        bqkv=jax.random.uniform(ks[1], (3 * d_model,), jnp.float32, -s, s),
        wout=jax.random.uniform(ks[2], (d_model, d_model), jnp.float32, -s, s),
        bout=jax.random.uniform(ks[3], (d_model,), jnp.float32, -s, s),
        wup=jax.random.uniform(ks[4], (d_model, 2 * d_model), jnp.float32, -s, s),
        bup=jax.random.uniform(ks[5], (2 * d_model,), jnp.float32, -s, s),
    )


def knowledge_attention_forward(context, event, mental, moral, params,
                                n_context_heads, n_event_heads,
                                n_mental_heads, n_moral_heads,
                                compute_dtype=jnp.bfloat16,
                                prepared_params=None, kv_tile=None):
    """Reproduces KnowledgeAttention.forward(return_weights=False, mask=None).

    The module's returned dict maps 'event' -> mental_o (its own bug), so the
    event stream's attention output is dead code and is not computed at all."""
    del event, n_event_heads                     # never used by the module's forward
    B = context.shape[0]
    streams = [("context", context, n_context_heads),
               ("mental", mental, n_mental_heads),
               ("moral", moral, n_moral_heads)]
    # Group streams with the same head count so they share ONE pallas_call
    # (weights are identical across streams: deepcopies at __init__).
    groups = OrderedDict()
    for name, x, h in streams:
        groups.setdefault(h, []).append((name, x))

    results = {}
    for h, items in groups.items():
        weights = prepared_params.get(h) if prepared_params else None
        if weights is None:
            weights = prepare_stream_params(params, h, compute_dtype)
        stacked = (jnp.concatenate([x for _, x in items], axis=0)
                   if len(items) > 1 else items[0][1])            # (len*B, S, D), f32
        fused = knowledge_streams_fused(stacked, weights, n_heads=h,
                                        compute_dtype=compute_dtype,
                                        kv_tile=kv_tile)
        for i, (name, _) in enumerate(items):
            results[name] = fused[i * B:(i + 1) * B]
    return OrderedDict([("context", results["context"]),
                        ("moral", results["moral"]),
                        ("mental", results["mental"]),
                        ("event", results["mental"])])


# ---------------------- pure-JAX reference (for checking) ---------------------
def _ref_stream(x, p, n_heads):
    B, S, D = x.shape
    dh = D // n_heads
    qkv = x @ p["wqkv"] + p["bqkv"]
    qkv = qkv.reshape(B, S, n_heads, 3 * dh).transpose(0, 2, 1, 3)
    q, k, v = qkv[..., :dh], qkv[..., dh:2 * dh], qkv[..., 2 * dh:]
    logits = jnp.einsum("bhqd,bhkd->bhqk", q, k) / sqrt(dh)
    attn = jax.nn.softmax(logits, axis=-1)
    o = jnp.einsum("bhqk,bhkd->bhqd", attn, v).transpose(0, 2, 1, 3).reshape(B, S, D)
    o = o @ p["wout"] + p["bout"]
    up = jax.nn.relu(o @ p["wup"] + p["bup"])
    return jnp.max(up.reshape(B, S, D, 2), axis=-1)   # MaxPool1d(2,2) over features


if __name__ == "__main__":
    B, S, D = 2, 8, 32
    heads = 2   # per-stream head count; D % heads == 0

    key = jax.random.PRNGKey(0)
    k_ctx, k_evt, k_men, k_mor, k_par, k_long = jax.random.split(key, 6)
    context = jax.random.normal(k_ctx, (B, S, D), jnp.float32)
    event = jax.random.normal(k_evt, (B, S, D), jnp.float32)   # stands in for encoder states
    mental = jax.random.normal(k_men, (B, S, D), jnp.float32)
    moral = jax.random.normal(k_mor, (B, S, D), jnp.float32)
    params = init_params(k_par, D)

    ref = OrderedDict([
        ("context", _ref_stream(context, params, heads)),
        ("moral", _ref_stream(moral, params, heads)),
        ("mental", _ref_stream(mental, params, heads)),
        ("event", _ref_stream(mental, params, heads)),   # module bug reproduced
    ])

    # Optimized bf16 path; folded weights prepared once and reused.
    prep_bf16 = prepare_knowledge_params(params, (heads,), jnp.bfloat16)
    out_bf16 = knowledge_attention_forward(context, event, mental, moral, params,
                                           heads, heads, heads, heads,
                                           prepared_params=prep_bf16)
    jax.block_until_ready(out_bf16)
    for name in out_bf16:
        assert out_bf16[name].shape == (B, S, D), name
        assert jnp.allclose(out_bf16[name], ref[name], rtol=8e-2, atol=8e-2), name

    # f32 path: structural check of the same kernel (tolerance also covers the
    # wout->wup fold reassociation under TPU default matmul precision).
    prep_f32 = prepare_knowledge_params(params, (heads,), jnp.float32)
    out_f32 = knowledge_attention_forward(context, event, mental, moral, params,
                                          heads, heads, heads, heads,
                                          compute_dtype=jnp.float32,
                                          prepared_params=prep_f32)
    jax.block_until_ready(out_f32)
    for name in out_f32:
        assert jnp.allclose(out_f32[name], ref[name], rtol=1e-2, atol=1e-2), name

    # Flash (KV-tiled) path: longer sequence with a forced small kv_tile so the
    # online-softmax branch is exercised and verified.
    S2, B2 = 256, 1
    kl = jax.random.split(k_long, 3)
    ctx2 = jax.random.normal(kl[0], (B2, S2, D), jnp.float32)
    men2 = jax.random.normal(kl[1], (B2, S2, D), jnp.float32)
    mor2 = jax.random.normal(kl[2], (B2, S2, D), jnp.float32)
    ref2 = {"context": _ref_stream(ctx2, params, heads),
            "mental": _ref_stream(men2, params, heads),
            "moral": _ref_stream(mor2, params, heads)}
    out_flash = knowledge_attention_forward(ctx2, ctx2, men2, mor2, params,
                                            heads, heads, heads, heads,
                                            prepared_params=prep_bf16,
                                            kv_tile=128)
    jax.block_until_ready(out_flash)
    for name in ("context", "mental", "moral"):
        assert out_flash[name].shape == (B2, S2, D), name
        assert jnp.allclose(out_flash[name], ref2[name], rtol=8e-2, atol=8e-2), name

    print("KERNEL_OK")
</pallas_src>

<mosaic_0001>
module attributes {stable_mosaic.version = 11 : i64} {
  func.func @_fused_stream_kernel(%arg0: i32, %arg1: memref<3x8x32xf32, #tpu.memory_space<vmem>>, %arg2: memref<32x32xbf16, #tpu.memory_space<vmem>>, %arg3: memref<32x32xbf16, #tpu.memory_space<vmem>>, %arg4: memref<32x32xbf16, #tpu.memory_space<vmem>>, %arg5: memref<1x32xf32, #tpu.memory_space<vmem>>, %arg6: memref<1x32xf32, #tpu.memory_space<vmem>>, %arg7: memref<1x32xf32, #tpu.memory_space<vmem>>, %arg8: memref<32x32xbf16, #tpu.memory_space<vmem>>, %arg9: memref<1x32xf32, #tpu.memory_space<vmem>>, %arg10: memref<32x32xbf16, #tpu.memory_space<vmem>>, %arg11: memref<1x32xf32, #tpu.memory_space<vmem>>, %arg12: memref<3x8x32xf32, #tpu.memory_space<vmem>>) attributes {dimension_semantics = [#tpu.dimension_semantics<parallel>], iteration_bounds = array<i64: 2>, scalar_prefetch = 0 : i64, scratch_operands = 0 : i64, tpu.core_type = #tpu.core_type<tc>, window_params = [{transform_indices = @transform_0, window_bounds = array<i64: 3, 8, 32>}, {pipeline_mode = #tpu.pipeline_mode<synchronous>, transform_indices = @transform_1, window_bounds = array<i64: 32, 32>}, {pipeline_mode = #tpu.pipeline_mode<synchronous>, transform_indices = @transform_2, window_bounds = array<i64: 32, 32>}, {pipeline_mode = #tpu.pipeline_mode<synchronous>, transform_indices = @transform_3, window_bounds = array<i64: 32, 32>}, {pipeline_mode = #tpu.pipeline_mode<synchronous>, transform_indices = @transform_4, window_bounds = array<i64: 1, 32>}, {pipeline_mode = #tpu.pipeline_mode<synchronous>, transform_indices = @transform_5, window_bounds = array<i64: 1, 32>}, {pipeline_mode = #tpu.pipeline_mode<synchronous>, transform_indices = @transform_6, window_bounds = array<i64: 1, 32>}, {pipeline_mode = #tpu.pipeline_mode<synchronous>, transform_indices = @transform_7, window_bounds = array<i64: 32, 32>}, {pipeline_mode = #tpu.pipeline_mode<synchronous>, transform_indices = @transform_8, window_bounds = array<i64: 1, 32>}, {pipeline_mode = #tpu.pipeline_mode<synchronous>, transform_indices = @transform_9, window_bounds = array<i64: 32, 32>}, {pipeline_mode = #tpu.pipeline_mode<synchronous>, transform_indices = @transform_10, window_bounds = array<i64: 1, 32>}, {transform_indices = @transform_11, window_bounds = array<i64: 3, 8, 32>}]} {
    %c0_i32 = arith.constant 0 : i32
    %c3_i32 = arith.constant 3 : i32
    %0 = arith.addi %c0_i32, %c3_i32 : i32
    %c1_i32 = arith.constant 1 : i32
    scf.for %arg13 = %c0_i32 to %0 step %c1_i32  : i32 {
      %1 = arith.index_cast %arg13 : i32 to index
      %c0 = arith.constant 0 : index
      %c0_1 = arith.constant 0 : index
      %2 = vector.load %arg1[%1, %c0, %c0_1] : memref<3x8x32xf32, #tpu.memory_space<vmem>>, vector<1x8x32xf32>
      %3 = vector.shape_cast %2 : vector<1x8x32xf32> to vector<8x32xf32>
      %4 = arith.truncf %3 : vector<8x32xf32> to vector<8x32xbf16>
      %c0_2 = arith.constant 0 : index
      %c0_3 = arith.constant 0 : index
      %5 = vector.load %arg2[%c0_2, %c0_3] : memref<32x32xbf16, #tpu.memory_space<vmem>>, vector<32x32xbf16>
      %cst = arith.constant dense<0.000000e+00> : vector<8x32xf32>
      %6 = tpu.matmul %4, %5, %cst {dimension_numbers = #tpu.dot_dimension_numbers<[1], [0], [0], [1], [0, 0, 1, 1], [], []>} : vector<8x32xbf16>, vector<32x32xbf16>, vector<8x32xf32> -> vector<8x32xf32>
      %c0_4 = arith.constant 0 : index
      %c0_5 = arith.constant 0 : index
      %7 = vector.load %arg5[%c0_4, %c0_5] : memref<1x32xf32, #tpu.memory_space<vmem>>, vector<1x32xf32>
      %8 = vector.broadcast %7 : vector<1x32xf32> to vector<8x32xf32>
      %9 = arith.addf %6, %8 : vector<8x32xf32>
      %10 = arith.truncf %9 : vector<8x32xf32> to vector<8x32xbf16>
      %c0_6 = arith.constant 0 : index
      %c0_7 = arith.constant 0 : index
      %11 = vector.load %arg3[%c0_6, %c0_7] : memref<32x32xbf16, #tpu.memory_space<vmem>>, vector<32x32xbf16>
      %cst_8 = arith.constant dense<0.000000e+00> : vector<8x32xf32>
      %12 = tpu.matmul %4, %11, %cst_8 {dimension_numbers = #tpu.dot_dimension_numbers<[1], [0], [0], [1], [0, 0, 1, 1], [], []>} : vector<8x32xbf16>, vector<32x32xbf16>, vector<8x32xf32> -> vector<8x32xf32>
      %c0_9 = arith.constant 0 : index
      %c0_10 = arith.constant 0 : index
      %13 = vector.load %arg6[%c0_9, %c0_10] : memref<1x32xf32, #tpu.memory_space<vmem>>, vector<1x32xf32>
      %14 = vector.broadcast %13 : vector<1x32xf32> to vector<8x32xf32>
      %15 = arith.addf %12, %14 : vector<8x32xf32>
      %16 = arith.truncf %15 : vector<8x32xf32> to vector<8x32xbf16>
      %c0_11 = arith.constant 0 : index
      %c0_12 = arith.constant 0 : index
      %17 = vector.load %arg4[%c0_11, %c0_12] : memref<32x32xbf16, #tpu.memory_space<vmem>>, vector<32x32xbf16>
      %cst_13 = arith.constant dense<0.000000e+00> : vector<8x32xf32>
      %18 = tpu.matmul %4, %17, %cst_13 {dimension_numbers = #tpu.dot_dimension_numbers<[1], [0], [0], [1], [0, 0, 1, 1], [], []>} : vector<8x32xbf16>, vector<32x32xbf16>, vector<8x32xf32> -> vector<8x32xf32>
      %c0_14 = arith.constant 0 : index
      %c0_15 = arith.constant 0 : index
      %19 = vector.load %arg7[%c0_14, %c0_15] : memref<1x32xf32, #tpu.memory_space<vmem>>, vector<1x32xf32>
      %20 = vector.broadcast %19 : vector<1x32xf32> to vector<8x32xf32>
      %21 = arith.addf %18, %20 : vector<8x32xf32>
      %22 = arith.truncf %21 : vector<8x32xf32> to vector<8x32xbf16>
      %cst_16 = arith.constant 0.000000e+00 : f32
      %23 = vector.broadcast %cst_16 : f32 to vector<8x32xf32>
      %cst_17 = arith.constant 0.000000e+00 : f32
      %24 = vector.broadcast %cst_17 : f32 to vector<8x32xf32>
      %25 = vector.extract_strided_slice %10 {offsets = [0, 0], sizes = [8, 16], strides = [1, 1]} : vector<8x32xbf16> to vector<8x16xbf16>
      %26 = vector.extract_strided_slice %16 {offsets = [0, 0], sizes = [8, 16], strides = [1, 1]} : vector<8x32xbf16> to vector<8x16xbf16>
      %27 = vector.extract_strided_slice %22 {offsets = [0, 0], sizes = [8, 16], strides = [1, 1]} : vector<8x32xbf16> to vector<8x16xbf16>
      %cst_18 = arith.constant dense<0.000000e+00> : vector<8x8xf32>
      %28 = tpu.matmul %25, %26, %cst_18 {dimension_numbers = #tpu.dot_dimension_numbers<[1], [1], [0], [0], [0, 0, 1, 0], [], []>} : vector<8x16xbf16>, vector<8x16xbf16>, vector<8x8xf32> -> vector<8x8xf32>
      %cst_19 = arith.constant dense<0xFF800000> : vector<8xf32>
      %29 = vector.multi_reduction <maximumf>, %28, %cst_19 [1] : vector<8x8xf32> to vector<8xf32>
      %30 = vector.shape_cast %29 : vector<8xf32> to vector<8x1xf32>
      %31 = vector.broadcast %30 : vector<8x1xf32> to vector<8x8xf32>
      %32 = arith.subf %28, %31 : vector<8x8xf32>
      %33 = math.exp %32 : vector<8x8xf32>
      %cst_20 = arith.constant dense<0.000000e+00> : vector<8xf32>
      %34 = vector.multi_reduction <add>, %33, %cst_20 [1] : vector<8x8xf32> to vector<8xf32>
      %35 = vector.shape_cast %34 : vector<8xf32> to vector<8x1xf32>
      %36 = arith.truncf %33 : vector<8x8xf32> to vector<8x8xbf16>
      %cst_21 = arith.constant dense<0.000000e+00> : vector<8x16xf32>
      %37 = tpu.matmul %36, %27, %cst_21 {dimension_numbers = #tpu.dot_dimension_numbers<[1], [0], [0], [1], [0, 0, 1, 1], [], []>} : vector<8x8xbf16>, vector<8x16xbf16>, vector<8x16xf32> -> vector<8x16xf32>
      %38 = tpu.reciprocal %35 {approx = true} : vector<8x1xf32> -> vector<8x1xf32>
      %39 = vector.broadcast %38 : vector<8x1xf32> to vector<8x16xf32>
      %40 = arith.mulf %37, %39 : vector<8x16xf32>
      %41 = arith.truncf %40 : vector<8x16xf32> to vector<8x16xbf16>
      %c0_22 = arith.constant 0 : index
      %c0_23 = arith.constant 0 : index
      %42 = vector.load %arg8[%c0_22, %c0_23] : memref<32x32xbf16, #tpu.memory_space<vmem>>, vector<16x32xbf16>
      %cst_24 = arith.constant dense<0.000000e+00> : vector<8x32xf32>
      %43 = tpu.matmul %41, %42, %cst_24 {dimension_numbers = #tpu.dot_dimension_numbers<[1], [0], [0], [1], [0, 0, 1, 1], [], []>} : vector<8x16xbf16>, vector<16x32xbf16>, vector<8x32xf32> -> vector<8x32xf32>
      %44 = arith.addf %23, %43 : vector<8x32xf32>
      %c0_25 = arith.constant 0 : index
      %c0_26 = arith.constant 0 : index
      %45 = vector.load %arg10[%c0_25, %c0_26] : memref<32x32xbf16, #tpu.memory_space<vmem>>, vector<16x32xbf16>
      %cst_27 = arith.constant dense<0.000000e+00> : vector<8x32xf32>
      %46 = tpu.matmul %41, %45, %cst_27 {dimension_numbers = #tpu.dot_dimension_numbers<[1], [0], [0], [1], [0, 0, 1, 1], [], []>} : vector<8x16xbf16>, vector<16x32xbf16>, vector<8x32xf32> -> vector<8x32xf32>
      %47 = arith.addf %24, %46 : vector<8x32xf32>
      %48 = vector.extract_strided_slice %10 {offsets = [0, 16], sizes = [8, 16], strides = [1, 1]} : vector<8x32xbf16> to vector<8x16xbf16>
      %49 = vector.extract_strided_slice %16 {offsets = [0, 16], sizes = [8, 16], strides = [1, 1]} : vector<8x32xbf16> to vector<8x16xbf16>
      %50 = vector.extract_strided_slice %22 {offsets = [0, 16], sizes = [8, 16], strides = [1, 1]} : vector<8x32xbf16> to vector<8x16xbf16>
      %cst_28 = arith.constant dense<0.000000e+00> : vector<8x8xf32>
      %51 = tpu.matmul %48, %49, %cst_28 {dimension_numbers = #tpu.dot_dimension_numbers<[1], [1], [0], [0], [0, 0, 1, 0], [], []>} : vector<8x16xbf16>, vector<8x16xbf16>, vector<8x8xf32> -> vector<8x8xf32>
      %cst_29 = arith.constant dense<0xFF800000> : vector<8xf32>
      %52 = vector.multi_reduction <maximumf>, %51, %cst_29 [1] : vector<8x8xf32> to vector<8xf32>
      %53 = vector.shape_cast %52 : vector<8xf32> to vector<8x1xf32>
      %54 = vector.broadcast %53 : vector<8x1xf32> to vector<8x8xf32>
      %55 = arith.subf %51, %54 : vector<8x8xf32>
      %56 = math.exp %55 : vector<8x8xf32>
      %cst_30 = arith.constant dense<0.000000e+00> : vector<8xf32>
      %57 = vector.multi_reduction <add>, %56, %cst_30 [1] : vector<8x8xf32> to vector<8xf32>
      %58 = vector.shape_cast %57 : vector<8xf32> to vector<8x1xf32>
      %59 = arith.truncf %56 : vector<8x8xf32> to vector<8x8xbf16>
      %cst_31 = arith.constant dense<0.000000e+00> : vector<8x16xf32>
      %60 = tpu.matmul %59, %50, %cst_31 {dimension_numbers = #tpu.dot_dimension_numbers<[1], [0], [0], [1], [0, 0, 1, 1], [], []>} : vector<8x8xbf16>, vector<8x16xbf16>, vector<8x16xf32> -> vector<8x16xf32>
      %61 = tpu.reciprocal %58 {approx = true} : vector<8x1xf32> -> vector<8x1xf32>
      %62 = vector.broadcast %61 : vector<8x1xf32> to vector<8x16xf32>
      %63 = arith.mulf %60, %62 : vector<8x16xf32>
      %64 = arith.truncf %63 : vector<8x16xf32> to vector<8x16xbf16>
      %c16 = arith.constant 16 : index
      %c0_32 = arith.constant 0 : index
      %65 = vector.load %arg8[%c16, %c0_32] : memref<32x32xbf16, #tpu.memory_space<vmem>>, vector<16x32xbf16>
      %cst_33 = arith.constant dense<0.000000e+00> : vector<8x32xf32>
      %66 = tpu.matmul %64, %65, %cst_33 {dimension_numbers = #tpu.dot_dimension_numbers<[1], [0], [0], [1], [0, 0, 1, 1], [], []>} : vector<8x16xbf16>, vector<16x32xbf16>, vector<8x32xf32> -> vector<8x32xf32>
      %67 = arith.addf %44, %66 : vector<8x32xf32>
      %c16_34 = arith.constant 16 : index
      %c0_35 = arith.constant 0 : index
      %68 = vector.load %arg10[%c16_34, %c0_35] : memref<32x32xbf16, #tpu.memory_space<vmem>>, vector<16x32xbf16>
      %cst_36 = arith.constant dense<0.000000e+00> : vector<8x32xf32>
      %69 = tpu.matmul %64, %68, %cst_36 {dimension_numbers = #tpu.dot_dimension_numbers<[1], [0], [0], [1], [0, 0, 1, 1], [], []>} : vector<8x16xbf16>, vector<16x32xbf16>, vector<8x32xf32> -> vector<8x32xf32>
      %70 = arith.addf %47, %69 : vector<8x32xf32>
      %c0_37 = arith.constant 0 : index
      %c0_38 = arith.constant 0 : index
      %71 = vector.load %arg9[%c0_37, %c0_38] : memref<1x32xf32, #tpu.memory_space<vmem>>, vector<1x32xf32>
      %72 = vector.broadcast %71 : vector<1x32xf32> to vector<8x32xf32>
      %73 = arith.addf %67, %72 : vector<8x32xf32>
      %c0_39 = arith.constant 0 : index
      %c0_40 = arith.constant 0 : index
      %74 = vector.load %arg11[%c0_39, %c0_40] : memref<1x32xf32, #tpu.memory_space<vmem>>, vector<1x32xf32>
      %75 = vector.broadcast %74 : vector<1x32xf32> to vector<8x32xf32>
      %76 = arith.addf %70, %75 : vector<8x32xf32>
      %cst_41 = arith.constant 0.000000e+00 : f32
      %77 = vector.broadcast %cst_41 : f32 to vector<8x32xf32>
      %78 = arith.maximumf %73, %77 : vector<8x32xf32>
      %cst_42 = arith.constant 0.000000e+00 : f32
      %79 = vector.broadcast %cst_42 : f32 to vector<8x32xf32>
      %80 = arith.maximumf %76, %79 : vector<8x32xf32>
      %81 = arith.maximumf %78, %80 : vector<8x32xf32>
      %82 = arith.index_cast %arg13 : i32 to index
      %c0_43 = arith.constant 0 : index
      %c0_44 = arith.constant 0 : index
      %83 = vector.load %arg12[%82, %c0_43, %c0_44] : memref<3x8x32xf32, #tpu.memory_space<vmem>>, vector<1x8x32xf32>
      %84 = vector.shape_cast %83 : vector<1x8x32xf32> to vector<8x32xf32>
      %85 = vector.shape_cast %81 : vector<8x32xf32> to vector<1x8x32xf32>
      tpu.vector_store %arg12[%82, %c0_43, %c0_44], %85 {strides = array<i32>} : memref<3x8x32xf32, #tpu.memory_space<vmem>>, vector<1x8x32xf32>,
    }
    %c3_i32_0 = arith.constant 3 : i32
    return
  }
  func.func @transform_0(%arg0: i32) -> (i32, i32, i32) {
    %c0_i32 = arith.constant 0 : i32
    %c0_i32_0 = arith.constant 0 : i32
    %c0_i32_1 = arith.constant 0 : i32
    return %arg0, %c0_i32, %c0_i32_0 : i32, i32, i32
  }
  func.func @transform_1(%arg0: i32) -> (i32, i32) {
    %c0_i32 = arith.constant 0 : i32
    %c0_i32_0 = arith.constant 0 : i32
    %c0_i32_1 = arith.constant 0 : i32
    return %c0_i32, %c0_i32_0 : i32, i32
  }
  func.func @transform_2(%arg0: i32) -> (i32, i32) {
    %c0_i32 = arith.constant 0 : i32
    %c0_i32_0 = arith.constant 0 : i32
    %c0_i32_1 = arith.constant 0 : i32
    return %c0_i32, %c0_i32_0 : i32, i32
  }
  func.func @transform_3(%arg0: i32) -> (i32, i32) {
    %c0_i32 = arith.constant 0 : i32
    %c0_i32_0 = arith.constant 0 : i32
    %c0_i32_1 = arith.constant 0 : i32
    return %c0_i32, %c0_i32_0 : i32, i32
  }
  func.func @transform_4(%arg0: i32) -> (i32, i32) {
    %c0_i32 = arith.constant 0 : i32
    %c0_i32_0 = arith.constant 0 : i32
    %c0_i32_1 = arith.constant 0 : i32
    return %c0_i32, %c0_i32_0 : i32, i32
  }
  func.func @transform_5(%arg0: i32) -> (i32, i32) {
    %c0_i32 = arith.constant 0 : i32
    %c0_i32_0 = arith.constant 0 : i32
    %c0_i32_1 = arith.constant 0 : i32
    return %c0_i32, %c0_i32_0 : i32, i32
  }
  func.func @transform_6(%arg0: i32) -> (i32, i32) {
    %c0_i32 = arith.constant 0 : i32
    %c0_i32_0 = arith.constant 0 : i32
    %c0_i32_1 = arith.constant 0 : i32
    return %c0_i32, %c0_i32_0 : i32, i32
  }
  func.func @transform_7(%arg0: i32) -> (i32, i32) {
    %c0_i32 = arith.constant 0 : i32
    %c0_i32_0 = arith.constant 0 : i32
    %c0_i32_1 = arith.constant 0 : i32
    return %c0_i32, %c0_i32_0 : i32, i32
  }
  func.func @transform_8(%arg0: i32) -> (i32, i32) {
    %c0_i32 = arith.constant 0 : i32
    %c0_i32_0 = arith.constant 0 : i32
    %c0_i32_1 = arith.constant 0 : i32
    return %c0_i32, %c0_i32_0 : i32, i32
  }
  func.func @transform_9(%arg0: i32) -> (i32, i32) {
    %c0_i32 = arith.constant 0 : i32
    %c0_i32_0 = arith.constant 0 : i32
    %c0_i32_1 = arith.constant 0 : i32
    return %c0_i32, %c0_i32_0 : i32, i32
  }
  func.func @transform_10(%arg0: i32) -> (i32, i32) {
    %c0_i32 = arith.constant 0 : i32
    %c0_i32_0 = arith.constant 0 : i32
    %c0_i32_1 = arith.constant 0 : i32
    return %c0_i32, %c0_i32_0 : i32, i32
  }
  func.func @transform_11(%arg0: i32) -> (i32, i32, i32) {
    %c0_i32 = arith.constant 0 : i32
    %c0_i32_0 = arith.constant 0 : i32
    %c0_i32_1 = arith.constant 0 : i32
    return %arg0, %c0_i32, %c0_i32_0 : i32, i32, i32
  }
}

module attributes {stable_mosaic.version = 11 : i64} {
  func.func @_fused_stream_kernel(%arg0: i32, %arg1: memref<3x8x32xf32, #tpu.memory_space<vmem>>, %arg2: memref<32x32xbf16, #tpu.memory_space<vmem>>, %arg3: memref<32x32xbf16, #tpu.memory_space<vmem>>, %arg4: memref<32x32xbf16, #tpu.memory_space<vmem>>, %arg5: memref<1x32xf32, #tpu.memory_space<vmem>>, %arg6: memref<1x32xf32, #tpu.memory_space<vmem>>, %arg7: memref<1x32xf32, #tpu.memory_space<vmem>>, %arg8: memref<32x32xbf16, #tpu.memory_space<vmem>>, %arg9: memref<1x32xf32, #tpu.memory_space<vmem>>, %arg10: memref<32x32xbf16, #tpu.memory_space<vmem>>, %arg11: memref<1x32xf32, #tpu.memory_space<vmem>>, %arg12: memref<3x8x32xf32, #tpu.memory_space<vmem>>) attributes {dimension_semantics = [#tpu.dimension_semantics<parallel>], iteration_bounds = array<i64: 2>, scalar_prefetch = 0 : i64, scratch_operands = 0 : i64, tpu.core_type = #tpu.core_type<tc>, window_params = [{transform_indices = @transform_0, window_bounds = array<i64: 3, 8, 32>}, {pipeline_mode = #tpu.pipeline_mode<synchronous>, transform_indices = @transform_1, window_bounds = array<i64: 32, 32>}, {pipeline_mode = #tpu.pipeline_mode<synchronous>, transform_indices = @transform_2, window_bounds = array<i64: 32, 32>}, {pipeline_mode = #tpu.pipeline_mode<synchronous>, transform_indices = @transform_3, window_bounds = array<i64: 32, 32>}, {pipeline_mode = #tpu.pipeline_mode<synchronous>, transform_indices = @transform_4, window_bounds = array<i64: 1, 32>}, {pipeline_mode = #tpu.pipeline_mode<synchronous>, transform_indices = @transform_5, window_bounds = array<i64: 1, 32>}, {pipeline_mode = #tpu.pipeline_mode<synchronous>, transform_indices = @transform_6, window_bounds = array<i64: 1, 32>}, {pipeline_mode = #tpu.pipeline_mode<synchronous>, transform_indices = @transform_7, window_bounds = array<i64: 32, 32>}, {pipeline_mode = #tpu.pipeline_mode<synchronous>, transform_indices = @transform_8, window_bounds = array<i64: 1, 32>}, {pipeline_mode = #tpu.pipeline_mode<synchronous>, transform_indices = @transform_9, window_bounds = array<i64: 32, 32>}, {pipeline_mode = #tpu.pipeline_mode<synchronous>, transform_indices = @transform_10, window_bounds = array<i64: 1, 32>}, {transform_indices = @transform_11, window_bounds = array<i64: 3, 8, 32>}]} {
    %c0_i32 = arith.constant 0 : i32
    %c3_i32 = arith.constant 3 : i32
    %0 = arith.addi %c0_i32, %c3_i32 : i32
    %c1_i32 = arith.constant 1 : i32
    scf.for %arg13 = %c0_i32 to %0 step %c1_i32  : i32 {
      %1 = arith.index_cast %arg13 : i32 to index
      %c0 = arith.constant 0 : index
      %c0_1 = arith.constant 0 : index
      %2 = vector.load %arg1[%1, %c0, %c0_1] : memref<3x8x32xf32, #tpu.memory_space<vmem>>, vector<1x8x32xf32>
      %3 = vector.shape_cast %2 : vector<1x8x32xf32> to vector<8x32xf32>
      %4 = arith.truncf %3 : vector<8x32xf32> to vector<8x32xbf16>
      %c0_2 = arith.constant 0 : index
      %c0_3 = arith.constant 0 : index
      %5 = vector.load %arg2[%c0_2, %c0_3] : memref<32x32xbf16, #tpu.memory_space<vmem>>, vector<32x32xbf16>
      %cst = arith.constant dense<0.000000e+00> : vector<8x32xf32>
      %6 = tpu.matmul %4, %5, %cst {dimension_numbers = #tpu.dot_dimension_numbers<[1], [0], [0], [1], [0, 0, 1, 1], [], []>} : vector<8x32xbf16>, vector<32x32xbf16>, vector<8x32xf32> -> vector<8x32xf32>
      %c0_4 = arith.constant 0 : index
      %c0_5 = arith.constant 0 : index
      %7 = vector.load %arg5[%c0_4, %c0_5] : memref<1x32xf32, #tpu.memory_space<vmem>>, vector<1x32xf32>
      %8 = vector.broadcast %7 : vector<1x32xf32> to vector<8x32xf32>
      %9 = arith.addf %6, %8 : vector<8x32xf32>
      %10 = arith.truncf %9 : vector<8x32xf32> to vector<8x32xbf16>
      %c0_6 = arith.constant 0 : index
      %c0_7 = arith.constant 0 : index
      %11 = vector.load %arg3[%c0_6, %c0_7] : memref<32x32xbf16, #tpu.memory_space<vmem>>, vector<32x32xbf16>
      %cst_8 = arith.constant dense<0.000000e+00> : vector<8x32xf32>
      %12 = tpu.matmul %4, %11, %cst_8 {dimension_numbers = #tpu.dot_dimension_numbers<[1], [0], [0], [1], [0, 0, 1, 1], [], []>} : vector<8x32xbf16>, vector<32x32xbf16>, vector<8x32xf32> -> vector<8x32xf32>
      %c0_9 = arith.constant 0 : index
      %c0_10 = arith.constant 0 : index
      %13 = vector.load %arg6[%c0_9, %c0_10] : memref<1x32xf32, #tpu.memory_space<vmem>>, vector<1x32xf32>
      %14 = vector.broadcast %13 : vector<1x32xf32> to vector<8x32xf32>
      %15 = arith.addf %12, %14 : vector<8x32xf32>
      %16 = arith.truncf %15 : vector<8x32xf32> to vector<8x32xbf16>
      %c0_11 = arith.constant 0 : index
      %c0_12 = arith.constant 0 : index
      %17 = vector.load %arg4[%c0_11, %c0_12] : memref<32x32xbf16, #tpu.memory_space<vmem>>, vector<32x32xbf16>
      %cst_13 = arith.constant dense<0.000000e+00> : vector<8x32xf32>
      %18 = tpu.matmul %4, %17, %cst_13 {dimension_numbers = #tpu.dot_dimension_numbers<[1], [0], [0], [1], [0, 0, 1, 1], [], []>} : vector<8x32xbf16>, vector<32x32xbf16>, vector<8x32xf32> -> vector<8x32xf32>
      %c0_14 = arith.constant 0 : index
      %c0_15 = arith.constant 0 : index
      %19 = vector.load %arg7[%c0_14, %c0_15] : memref<1x32xf32, #tpu.memory_space<vmem>>, vector<1x32xf32>
      %20 = vector.broadcast %19 : vector<1x32xf32> to vector<8x32xf32>
      %21 = arith.addf %18, %20 : vector<8x32xf32>
      %22 = arith.truncf %21 : vector<8x32xf32> to vector<8x32xbf16>
      %cst_16 = arith.constant 0.000000e+00 : f32
      %23 = vector.broadcast %cst_16 : f32 to vector<8x32xf32>
      %cst_17 = arith.constant 0.000000e+00 : f32
      %24 = vector.broadcast %cst_17 : f32 to vector<8x32xf32>
      %25 = vector.extract_strided_slice %10 {offsets = [0, 0], sizes = [8, 16], strides = [1, 1]} : vector<8x32xbf16> to vector<8x16xbf16>
      %26 = vector.extract_strided_slice %16 {offsets = [0, 0], sizes = [8, 16], strides = [1, 1]} : vector<8x32xbf16> to vector<8x16xbf16>
      %27 = vector.extract_strided_slice %22 {offsets = [0, 0], sizes = [8, 16], strides = [1, 1]} : vector<8x32xbf16> to vector<8x16xbf16>
      %cst_18 = arith.constant dense<0.000000e+00> : vector<8x8xf32>
      %28 = tpu.matmul %25, %26, %cst_18 {dimension_numbers = #tpu.dot_dimension_numbers<[1], [1], [0], [0], [0, 0, 1, 0], [], []>} : vector<8x16xbf16>, vector<8x16xbf16>, vector<8x8xf32> -> vector<8x8xf32>
      %cst_19 = arith.constant dense<0xFF800000> : vector<8xf32>
      %29 = vector.multi_reduction <maximumf>, %28, %cst_19 [1] : vector<8x8xf32> to vector<8xf32>
      %30 = vector.shape_cast %29 : vector<8xf32> to vector<8x1xf32>
      %31 = vector.broadcast %30 : vector<8x1xf32> to vector<8x8xf32>
      %32 = arith.subf %28, %31 : vector<8x8xf32>
      %33 = math.exp %32 : vector<8x8xf32>
      %cst_20 = arith.constant dense<0.000000e+00> : vector<8xf32>
      %34 = vector.multi_reduction <add>, %33, %cst_20 [1] : vector<8x8xf32> to vector<8xf32>
      %35 = vector.shape_cast %34 : vector<8xf32> to vector<8x1xf32>
      %36 = arith.truncf %33 : vector<8x8xf32> to vector<8x8xbf16>
      %cst_21 = arith.constant dense<0.000000e+00> : vector<8x16xf32>
      %37 = tpu.matmul %36, %27, %cst_21 {dimension_numbers = #tpu.dot_dimension_numbers<[1], [0], [0], [1], [0, 0, 1, 1], [], []>} : vector<8x8xbf16>, vector<8x16xbf16>, vector<8x16xf32> -> vector<8x16xf32>
      %38 = tpu.reciprocal %35 {approx = true} : vector<8x1xf32> -> vector<8x1xf32>
      %39 = vector.broadcast %38 : vector<8x1xf32> to vector<8x16xf32>
      %40 = arith.mulf %37, %39 : vector<8x16xf32>
      %41 = arith.truncf %40 : vector<8x16xf32> to vector<8x16xbf16>
      %c0_22 = arith.constant 0 : index
      %c0_23 = arith.constant 0 : index
      %42 = vector.load %arg8[%c0_22, %c0_23] : memref<32x32xbf16, #tpu.memory_space<vmem>>, vector<16x32xbf16>
      %cst_24 = arith.constant dense<0.000000e+00> : vector<8x32xf32>
      %43 = tpu.matmul %41, %42, %cst_24 {dimension_numbers = #tpu.dot_dimension_numbers<[1], [0], [0], [1], [0, 0, 1, 1], [], []>} : vector<8x16xbf16>, vector<16x32xbf16>, vector<8x32xf32> -> vector<8x32xf32>
      %44 = arith.addf %23, %43 : vector<8x32xf32>
      %c0_25 = arith.constant 0 : index
      %c0_26 = arith.constant 0 : index
      %45 = vector.load %arg10[%c0_25, %c0_26] : memref<32x32xbf16, #tpu.memory_space<vmem>>, vector<16x32xbf16>
      %cst_27 = arith.constant dense<0.000000e+00> : vector<8x32xf32>
      %46 = tpu.matmul %41, %45, %cst_27 {dimension_numbers = #tpu.dot_dimension_numbers<[1], [0], [0], [1], [0, 0, 1, 1], [], []>} : vector<8x16xbf16>, vector<16x32xbf16>, vector<8x32xf32> -> vector<8x32xf32>
      %47 = arith.addf %24, %46 : vector<8x32xf32>
      %48 = vector.extract_strided_slice %10 {offsets = [0, 16], sizes = [8, 16], strides = [1, 1]} : vector<8x32xbf16> to vector<8x16xbf16>
      %49 = vector.extract_strided_slice %16 {offsets = [0, 16], sizes = [8, 16], strides = [1, 1]} : vector<8x32xbf16> to vector<8x16xbf16>
      %50 = vector.extract_strided_slice %22 {offsets = [0, 16], sizes = [8, 16], strides = [1, 1]} : vector<8x32xbf16> to vector<8x16xbf16>
      %cst_28 = arith.constant dense<0.000000e+00> : vector<8x8xf32>
      %51 = tpu.matmul %48, %49, %cst_28 {dimension_numbers = #tpu.dot_dimension_numbers<[1], [1], [0], [0], [0, 0, 1, 0], [], []>} : vector<8x16xbf16>, vector<8x16xbf16>, vector<8x8xf32> -> vector<8x8xf32>
      %cst_29 = arith.constant dense<0xFF800000> : vector<8xf32>
      %52 = vector.multi_reduction <maximumf>, %51, %cst_29 [1] : vector<8x8xf32> to vector<8xf32>
      %53 = vector.shape_cast %52 : vector<8xf32> to vector<8x1xf32>
      %54 = vector.broadcast %53 : vector<8x1xf32> to vector<8x8xf32>
      %55 = arith.subf %51, %54 : vector<8x8xf32>
      %56 = math.exp %55 : vector<8x8xf32>
      %cst_30 = arith.constant dense<0.000000e+00> : vector<8xf32>
      %57 = vector.multi_reduction <add>, %56, %cst_30 [1] : vector<8x8xf32> to vector<8xf32>
      %58 = vector.shape_cast %57 : vector<8xf32> to vector<8x1xf32>
      %59 = arith.truncf %56 : vector<8x8xf32> to vector<8x8xbf16>
      %cst_31 = arith.constant dense<0.000000e+00> : vector<8x16xf32>
      %60 = tpu.matmul %59, %50, %cst_31 {dimension_numbers = #tpu.dot_dimension_numbers<[1], [0], [0], [1], [0, 0, 1, 1], [], []>} : vector<8x8xbf16>, vector<8x16xbf16>, vector<8x16xf32> -> vector<8x16xf32>
      %61 = tpu.reciprocal %58 {approx = true} : vector<8x1xf32> -> vector<8x1xf32>
      %62 = vector.broadcast %61 : vector<8x1xf32> to vector<8x16xf32>
      %63 = arith.mulf %60, %62 : vector<8x16xf32>
      %64 = arith.truncf %63 : vector<8x16xf32> to vector<8x16xbf16>
      %c16 = arith.constant 16 : index
      %c0_32 = arith.constant 0 : index
      %65 = vector.load %arg8[%c16, %c0_32] : memref<32x32xbf16, #tpu.memory_space<vmem>>, vector<16x32xbf16>
      %cst_33 = arith.constant dense<0.000000e+00> : vector<8x32xf32>
      %66 = tpu.matmul %64, %65, %cst_33 {dimension_numbers = #tpu.dot_dimension_numbers<[1], [0], [0], [1], [0, 0, 1, 1], [], []>} : vector<8x16xbf16>, vector<16x32xbf16>, vector<8x32xf32> -> vector<8x32xf32>
      %67 = arith.addf %44, %66 : vector<8x32xf32>
      %c16_34 = arith.constant 16 : index
      %c0_35 = arith.constant 0 : index
      %68 = vector.load %arg10[%c16_34, %c0_35] : memref<32x32xbf16, #tpu.memory_space<vmem>>, vector<16x32xbf16>
      %cst_36 = arith.constant dense<0.000000e+00> : vector<8x32xf32>
      %69 = tpu.matmul %64, %68, %cst_36 {dimension_numbers = #tpu.dot_dimension_numbers<[1], [0], [0], [1], [0, 0, 1, 1], [], []>} : vector<8x16xbf16>, vector<16x32xbf16>, vector<8x32xf32> -> vector<8x32xf32>
      %70 = arith.addf %47, %69 : vector<8x32xf32>
      %c0_37 = arith.constant 0 : index
      %c0_38 = arith.constant 0 : index
      %71 = vector.load %arg9[%c0_37, %c0_38] : memref<1x32xf32, #tpu.memory_space<vmem>>, vector<1x32xf32>
      %72 = vector.broadcast %71 : vector<1x32xf32> to vector<8x32xf32>
      %73 = arith.addf %67, %72 : vector<8x32xf32>
      %c0_39 = arith.constant 0 : index
      %c0_40 = arith.constant 0 : index
      %74 = vector.load %arg11[%c0_39, %c0_40] : memref<1x32xf32, #tpu.memory_space<vmem>>, vector<1x32xf32>
      %75 = vector.broadcast %74 : vector<1x32xf32> to vector<8x32xf32>
      %76 = arith.addf %70, %75 : vector<8x32xf32>
      %cst_41 = arith.constant 0.000000e+00 : f32
      %77 = vector.broadcast %cst_41 : f32 to vector<8x32xf32>
      %78 = arith.maximumf %73, %77 : vector<8x32xf32>
      %cst_42 = arith.constant 0.000000e+00 : f32
      %79 = vector.broadcast %cst_42 : f32 to vector<8x32xf32>
      %80 = arith.maximumf %76, %79 : vector<8x32xf32>
      %81 = arith.maximumf %78, %80 : vector<8x32xf32>
      %82 = arith.index_cast %arg13 : i32 to index
      %c0_43 = arith.constant 0 : index
      %c0_44 = arith.constant 0 : index
      %83 = vector.load %arg12[%82, %c0_43, %c0_44] : memref<3x8x32xf32, #tpu.memory_space<vmem>>, vector<1x8x32xf32>
      %84 = vector.shape_cast %83 : vector<1x8x32xf32> to vector<8x32xf32>
      %85 = vector.shape_cast %81 : vector<8x32xf32> to vector<1x8x32xf32>
      tpu.vector_store %arg12[%82, %c0_43, %c0_44], %85 {strides = array<i32>} : memref<3x8x32xf32, #tpu.memory_space<vmem>>, vector<1x8x32xf32>,
    }
    %c3_i32_0 = arith.constant 3 : i32
    return
  }
  func.func @transform_0(%arg0: i32) -> (i32, i32, i32) {
    %c0_i32 = arith.constant 0 : i32
    %c0_i32_0 = arith.constant 0 : i32
    %c0_i32_1 = arith.constant 0 : i32
    return %arg0, %c0_i32, %c0_i32_0 : i32, i32, i32
  }
  func.func @transform_1(%arg0: i32) -> (i32, i32) {
    %c0_i32 = arith.constant 0 : i32
    %c0_i32_0 = arith.constant 0 : i32
    %c0_i32_1 = arith.constant 0 : i32
    return %c0_i32, %c0_i32_0 : i32, i32
  }
  func.func @transform_2(%arg0: i32) -> (i32, i32) {
    %c0_i32 = arith.constant 0 : i32
    %c0_i32_0 = arith.constant 0 : i32
    %c0_i32_1 = arith.constant 0 : i32
    return %c0_i32, %c0_i32_0 : i32, i32
  }
  func.func @transform_3(%arg0: i32) -> (i32, i32) {
    %c0_i32 = arith.constant 0 : i32
    %c0_i32_0 = arith.constant 0 : i32
    %c0_i32_1 = arith.constant 0 : i32
    return %c0_i32, %c0_i32_0 : i32, i32
  }
  func.func @transform_4(%arg0: i32) -> (i32, i32) {
    %c0_i32 = arith.constant 0 : i32
    %c0_i32_0 = arith.constant 0 : i32
    %c0_i32_1 = arith.constant 0 : i32
    return %c0_i32, %c0_i32_0 : i32, i32
  }
  func.func @transform_5(%arg0: i32) -> (i32, i32) {
    %c0_i32 = arith.constant 0 : i32
    %c0_i32_0 = arith.constant 0 : i32
    %c0_i32_1 = arith.constant 0 : i32
    return %c0_i32, %c0_i32_0 : i32, i32
  }
  func.func @transform_6(%arg0: i32) -> (i32, i32) {
    %c0_i32 = arith.constant 0 : i32
    %c0_i32_0 = arith.constant 0 : i32
    %c0_i32_1 = arith.constant 0 : i32
    return %c0_i32, %c0_i32_0 : i32, i32
  }
  func.func @transform_7(%arg0: i32) -> (i32, i32) {
    %c0_i32 = arith.constant 0 : i32
    %c0_i32_0 = arith.constant 0 : i32
    %c0_i32_1 = arith.constant 0 : i32
    return %c0_i32, %c0_i32_0 : i32, i32
  }
  func.func @transform_8(%arg0: i32) -> (i32, i32) {
    %c0_i32 = arith.constant 0 : i32
    %c0_i32_0 = arith.constant 0 : i32
    %c0_i32_1 = arith.constant 0 : i32
    return %c0_i32, %c0_i32_0 : i32, i32
  }
  func.func @transform_9(%arg0: i32) -> (i32, i32) {
    %c0_i32 = arith.constant 0 : i32
    %c0_i32_0 = arith.constant 0 : i32
    %c0_i32_1 = arith.constant 0 : i32
    return %c0_i32, %c0_i32_0 : i32, i32
  }
  func.func @transform_10(%arg0: i32) -> (i32, i32) {
    %c0_i32 = arith.constant 0 : i32
    %c0_i32_0 = arith.constant 0 : i32
    %c0_i32_1 = arith.constant 0 : i32
    return %c0_i32, %c0_i32_0 : i32, i32
  }
  func.func @transform_11(%arg0: i32) -> (i32, i32, i32) {
    %c0_i32 = arith.constant 0 : i32
    %c0_i32_0 = arith.constant 0 : i32
    %c0_i32_1 = arith.constant 0 : i32
    return %arg0, %c0_i32, %c0_i32_0 : i32, i32, i32
  }
}

</mosaic_0001>

<bundles_post_ra>
// kernel: tpu_custom_call.1
= control target key start
LH: loop header
LB: loop body
LE: loop exit
PB: predicated region body
PF: predicated region fallthrough
CT: control target
= control target key end

     0   :  { %s2290_s0 = inlined_call_operand.hbm [shape: f32[6,8,32], index: 0, kind: input, shape index: {}]   ;;  %s2291_s1 = inlined_call_operand.hbm [shape: bf16[32,32], index: 1, kind: input, shape index: {}]   ;;  %s2292_s2 = inlined_call_operand.hbm [shape: bf16[32,32], index: 2, kind: input, shape index: {}]   ;;  %s2293_s3 = inlined_call_operand.hbm [shape: bf16[32,32], index: 3, kind: input, shape index: {}]   ;;  %s2294_s4 = inlined_call_operand.vmem [shape: f32[1,32], index: 4, kind: input, shape index: {}]   ;;  %s2295_s5 = inlined_call_operand.vmem [shape: f32[1,32], index: 5, kind: input, shape index: {}]   ;;  %s2296_s6 = inlined_call_operand.hbm [shape: f32[1,32], index: 6, kind: input, shape index: {}]   ;;  %s2297_s7 = inlined_call_operand.vmem [shape: bf16[32,32], index: 7, kind: input, shape index: {}]   ;;  %s2298_s8 = inlined_call_operand.hbm [shape: f32[1,32], index: 8, kind: input, shape index: {}]   ;;  %s2299_s9 = inlined_call_operand.vmem [shape: bf16[32,32], index: 9, kind: input, shape index: {}]   ;;  %s2300_s10 = inlined_call_operand.vmem [shape: f32[1,32], index: 10, kind: input, shape index: {}]   ;;  %s2301_s11 = inlined_call_operand.hbm [shape: f32[6,8,32], index: 11, kind: output, shape index: {}]  }
   0x1   :  { %2307 = sst [smem:[#allocation19_spill]] %s2291_s1 }
   0x2   :  { %2308 = sst [smem:[#allocation20_spill]] %s2292_s2 }
   0x3   :  { %2309 = sst [smem:[#allocation21_spill]] %s2299_s9 }
   0x4   :  { %2310 = sst [smem:[#allocation22_spill]] %s2300_s10 }
   0x5   :  { %2311 = sst [smem:[#allocation23_spill]] %s2301_s11 }
   0x6   :  { %16 = vsyncpa [#allocation3], 0 }
   0x7   :  { %18 = vsyncpa [#allocation3 + $0x1], 0 }
   0x8   :  { %19 = vsyncpa [#allocation6], 0 }
   0x9   :  { %20 = vsyncpa [#allocation9], 0 }
   0xa   :  { %21 = vsyncpa [#allocation12], 0 }
   0xb   :  { %22 = vsyncpa [#allocation4], 0 }
   0xc   :  { %24 = vsyncpa [#allocation4 + $0x1], 0  ;;  %s1880_s17 = smov 0   ;;  %s1882_s18 = smov 0  }
   0xd   :  { %s1884_s19 = smov 0   ;;  %s1886_s20 = smov 0  }
   0xe LB: > { %s1804_s21 = smov [#allocation5]   ;;  %s1901_s23 = sadd.s32 4294967295, %s1798_s20   ;;  %s1798_s20 = sphi %s1886_s20, %s2338_s20   ;;  %s1794_s19 = sphi %s1884_s19, %s2337_s19   ;;  %s1790_s18 = sphi %s1882_s18, %s2336_s18   ;;  %s1786_s17 = sphi %s1880_s17, %s2335_s17  }
   0xf   : > { %s309_s22 = sshll.u32 %s1804_s21, 4  ;;  %p1269_p0 = scmp.ge.s32.totalorder %s1798_s20, 1  ;;  %s1906_s22 = int_to_ptr.vmem [resolvable:$true] %s309_s22 }
  0x10   : > { %p2304_p1 = scmp.eq.s32.totalorder %s1901_s23, 0  ;;  %p297_p2 = scmp.lt.s32.totalorder %s1798_s20, 3 }
  0x11   : > { %s1805_s25 = smov [#allocation8]   ;;  %s1806_s28 = smov [#allocation7]  }
  0x12   : > { %p1908_p3 = pnand %p1269_p0, %p297_p2  ;;  %s335_s26 = sshll.u32 %s1805_s25, 4  ;;  %s1921_s26 = int_to_ptr.vmem [resolvable:$true] %s335_s26 }
  0x13   : > { %s322_s29 = sshll.u32 %s1806_s28, 4  ;;  %s2314_s1 = sld [smem:[#allocation19_spill]]  ;;  %s1923_s29 = int_to_ptr.vmem [resolvable:$true] %s322_s29 }
  0x14   : > { %s2312_s24 = scalar_select %p1908_p3, 1, 0 }
  0x15   : > { %p1438_p5 = pneg %p1908_p3 }
  0x17   : > { %p1917_p6 = pnand %p1438_p5, %p2304_p1 }
  0x19   : > { %s1546_s13 = scalar_lea.hbm %s2314_s1, 256  ;;  %p1933_p8 = pneg %p1917_p6 }
  0x1a   : > { %p1547_p7 = scmp.ne.s32.totalorder %s2314_s1, %s1546_s13  ;;  %p1553_p11 = scmp.lt.u32.totalorder %s1546_s13, %s2314_s1 }
  0x1c   : > { %p1549_p9 = pnand %p1933_p8, %p1547_p7 }
  0x1e   : > { %p1550_p10 = pneg %p1549_p9 }
  0x20   : > { %p1555_p12 = pnand %p1553_p11, %p1550_p10 }
  0x22   : > { %1558 = shalt.err (!%p1555_p12)
}
  0x23   : > { %s1559_s28 = scalar_lea.vmem %s1906_s22, 256  ;;  %p1567_p5 = scmp.lt.s32.totalorder %s1906_s22, %s1906_s22 }
  0x24   : > { %p1560_p13 = scmp.ne.s32.totalorder %s1906_s22, %s1559_s28  ;;  %p1568_p4 = scmp.lt.s32.totalorder %s1559_s28, %s1559_s28 }
  0x26   : > { %p1562_p0 = pnand %p1560_p13, %p1933_p8  ;;  %p1569_p7 = por %p1568_p4, %p1567_p5 }
  0x28   : > { %p1563_p2 = pneg %p1562_p0 }
  0x2a   : > { %p1570_p9 = pnand %p1569_p7, %p1563_p2 }
  0x2c   : > { %1573 = shalt.err (!%p1570_p9)
}
  0x2d   : > { %s1807_s30 = smov 64   ;;  %s1808_s12 = smov 4  }
  0x2e   : > { %1441 = dma.hbm_to_vmem [thread:$0]  (!%p1917_p6), %s2314_s1, 256, %s1906_s22, [#allocation6], %s1807_s30, %s1807_s30, %s1808_s12  }
  0x2f   : > { %s1574_s25 = scalar_lea.hbm %s2293_s3, 256 }
  0x30   : > { %p1575_p4 = scmp.ne.s32.totalorder %s2293_s3, %s1574_s25  ;;  %p1581_p12 = scmp.lt.u32.totalorder %s1574_s25, %s2293_s3 }
  0x32   : > { %p1577_p10 = pnand %p1575_p4, %p1933_p8 }
  0x34   : > { %p1578_p11 = pneg %p1577_p10 }
  0x36   : > { %p1583_p13 = pnand %p1581_p12, %p1578_p11 }
  0x38   : > { %1586 = shalt.err (!%p1583_p13)
}
  0x39   : > { %s1587_s22 = scalar_lea.vmem %s1921_s26, 256  ;;  %p1595_p7 = scmp.lt.s32.totalorder %s1921_s26, %s1921_s26 }
  0x3a   : > { %p1588_p0 = scmp.ne.s32.totalorder %s1921_s26, %s1587_s22  ;;  %p1596_p9 = scmp.lt.s32.totalorder %s1587_s22, %s1587_s22 }
  0x3c   : > { %p1590_p2 = pnand %p1588_p0, %p1933_p8  ;;  %p1597_p4 = por %p1596_p9, %p1595_p7 }
  0x3e   : > { %p1591_p5 = pneg %p1590_p2 }
  0x40   : > { %p1598_p10 = pnand %p1597_p4, %p1591_p5 }
  0x42   : > { %1601 = shalt.err (!%p1598_p10)
}
  0x43   : > { %1447 = dma.hbm_to_vmem [thread:$0]  (!%p1917_p6), %s2293_s3, 256, %s1921_s26, [#allocation9], %s1807_s30, %s1807_s30, %s1808_s12  }
  0x44   : > { %s2316_s2 = sld [smem:[#allocation20_spill]] }
  0x4a   : > { %s1602_s14 = scalar_lea.hbm %s2316_s2, 256 }
  0x4b   : > { %p1603_p11 = scmp.ne.s32.totalorder %s2316_s2, %s1602_s14  ;;  %p1609_p0 = scmp.lt.u32.totalorder %s1602_s14, %s2316_s2 }
  0x4d   : > { %p1605_p12 = pnand %p1603_p11, %p1933_p8 }
  0x4f   : > { %p1606_p13 = pneg %p1605_p12 }
  0x51   : > { %p1611_p2 = pnand %p1609_p0, %p1606_p13 }
  0x53   : > { %1614 = shalt.err (!%p1611_p2)
}
  0x54   : > { %s1615_s26 = scalar_lea.vmem %s1923_s29, 256  ;;  %p1623_p4 = scmp.lt.s32.totalorder %s1923_s29, %s1923_s29 }
  0x55   : > { %p1616_p5 = scmp.ne.s32.totalorder %s1923_s29, %s1615_s26  ;;  %p1624_p10 = scmp.lt.s32.totalorder %s1615_s26, %s1615_s26 }
  0x57   : > { %p1618_p7 = pnand %p1616_p5, %p1933_p8  ;;  %p1625_p11 = por %p1624_p10, %p1623_p4 }
  0x59   : > { %p1619_p9 = pneg %p1618_p7 }
  0x5b   : > { %p1626_p12 = pnand %p1625_p11, %p1619_p9 }
  0x5d   : > { %1629 = shalt.err (!%p1626_p12)
}
  0x5e   : > { %1444 = dma.hbm_to_vmem [thread:$0]  (!%p1917_p6), %s2316_s2, 256, %s1923_s29, [#allocation6], %s1807_s30, %s1807_s30, %s1808_s12  }
  0x5f   : > { %s1809_s10 = smov [#allocation10]   ;;  %s1810_s13 = smov [#allocation11]  }
  0x60   : > { %s355_s11 = sshll.u32 %s1809_s10, 4  ;;  %s369_s14 = sshll.u32 %s1810_s13, 4  ;;  %s356_s11 = int_to_ptr.vmem [resolvable:$true] %s355_s11  ;;  %s370_s14 = int_to_ptr.vmem [resolvable:$true] %s369_s14 }
  0x61   : > { %s1630_s25 = scalar_lea.hbm %s2296_s6, 16 }
  0x62   : > { %p1631_p13 = scmp.ne.s32.totalorder %s2296_s6, %s1630_s25  ;;  %p1637_p5 = scmp.lt.u32.totalorder %s1630_s25, %s2296_s6 }
  0x64   : > { %p1633_p0 = pnand %p1631_p13, %p1933_p8 }
  0x66   : > { %p1634_p2 = pneg %p1633_p0 }
  0x68   : > { %p1639_p7 = pnand %p1637_p5, %p1634_p2 }
  0x6a   : > { %1642 = shalt.err (!%p1639_p7)
}
  0x6b   : > { %s1643_s29 = scalar_lea.vmem %s356_s11, 16  ;;  %s1650_s30 = scalar_lea.vmem %s356_s11, 32 }
  0x6c   : > { %p1644_p9 = scmp.ne.s32.totalorder %s356_s11, %s1643_s29  ;;  %p1651_p11 = scmp.lt.s32.totalorder %s356_s11, %s356_s11 }
  0x6d   : > { %p1652_p12 = scmp.lt.s32.totalorder %s1650_s30, %s1643_s29 }
  0x6e   : > { %p1646_p4 = pnand %p1644_p9, %p1933_p8 }
  0x6f   : > { %p1653_p1 = por %p1652_p12, %p1651_p11 }
  0x70   : > { %p1647_p10 = pneg %p1646_p4 }
  0x72   : > { %p1654_p3 = pnand %p1653_p1, %p1647_p10 }
  0x74   : > { %1657 = shalt.err (!%p1654_p3)
}
  0x75   : > { %1450 = dma.hbm_to_vmem [thread:$0]  (!%p1917_p6), %s2296_s6, 16, %s356_s11, [#allocation9]  }
  0x76   : > { %s1658_s13 = scalar_lea.hbm %s2298_s8, 16 }
  0x77   : > { %p1659_p13 = scmp.ne.s32.totalorder %s2298_s8, %s1658_s13  ;;  %p1665_p3 = scmp.lt.u32.totalorder %s1658_s13, %s2298_s8 }
  0x79   : > { %p1661_p0 = pnand %p1659_p13, %p1933_p8 }
  0x7b   : > { %p1662_p1 = pneg %p1661_p0 }
  0x7d   : > { %p1667_p2 = pnand %p1665_p3, %p1662_p1 }
  0x7f   : > { %1670 = shalt.err (!%p1667_p2)
}
  0x80   : > { %s1671_s26 = scalar_lea.vmem %s370_s14, 16  ;;  %s1678_s11 = scalar_lea.vmem %s370_s14, 32 }
  0x81   : > { %p1672_p5 = scmp.ne.s32.totalorder %s370_s14, %s1671_s26  ;;  %p1679_p4 = scmp.lt.s32.totalorder %s370_s14, %s370_s14 }
  0x82   : > { %p1680_p10 = scmp.lt.s32.totalorder %s1678_s11, %s1671_s26 }
  0x83   : > { %p1674_p7 = pnand %p1672_p5, %p1933_p8 }
  0x84   : > { %p1681_p11 = por %p1680_p10, %p1679_p4 }
  0x85   : > { %p1675_p9 = pneg %p1674_p7 }
  0x87   : > { %p1682_p12 = pnand %p1681_p11, %p1675_p9 }
  0x89   : > { %1685 = shalt.err (!%p1682_p12)
}
  0x8a   : > { %1453 = dma.hbm_to_vmem [thread:$0]  (!%p1917_p6), %s2298_s8, 16, %s370_s14, [#allocation12]  }
  0x8b   : > { %s1268_s16 = sadd.s32 4294967294, %s1798_s20   ;;  %s2047_s27 = sadd.s32 1, %s1798_s20  }
  0x8c   : > { %s37_s30 = sadd.s32 1, %s1794_s19  ;;  %s34_s12 = ssub.s32 %s1798_s20, %s2047_s27 }
  0x8d   : > { %p44_p8 = scmp.ne.s32.totalorder %s1794_s19, %s1790_s18  ;;  %p35_p13 = scmp.eq.s32.totalorder %s34_s12, 0 }
  0x8e   : > { %p45_p0 = scmp.eq.s32.totalorder %s1798_s20, 0  ;;  %p50_p1 = scmp.ne.s32.totalorder %s1790_s18, %s1786_s17 }
  0x8f   : > { %p284_p3 = scmp.eq.s32.totalorder %s1901_s23, 1  ;;  %p2317_p5 = scmp.eq.s32.totalorder %s1901_s23, 0 }
  0x90   : > { %s2059_s9 = scalar_select %p35_p13, %s1794_s19, %s37_s30  }
  0x91   : > { %p46_p2 = por %p45_p0, %p44_p8  ;;  %p2063_p7 = por %p2317_p5, %p50_p1 }
  0x92   : > { %p2067_p6 = por %p284_p3, %p44_p8  ;;  %p290_p9 = scmp.eq.s32.totalorder %s1268_s16, 1 }
  0x93   : > { %p1467_p4 = scmp.lt.s32.totalorder %s1798_s20, 2  ;;  %s386_s10 = sand.u32 1, %s1794_s19  }
  0x94   : > { %s2319_s14 = scalar_select %p2067_p6, 1, 0 }
  0x95   : > { %p2073_p10 = por %p290_p9, %p50_p1  ;;  %s1412_s15 = smul.u32 24, %s386_s10 }
  0x96   : > { %p2077_p11 = pnand %p1467_p4, %p46_p2  ;;  %s1313_s25 = smul.u32 384, %s1798_s20 }
  0x97   : > { %s2320_s13 = scalar_select %p2073_p10, 1, 0 }
  0x98   : > { %s2085_s11 = scalar_lea.hbm %s2290_s0, %s1313_s25  ;;  %s390_s22 = scalar_lea.vmem [#allocation2], %s1412_s15 }
  0x99   : > { %s397_s29 = sshll.u32 %s390_s22, 4  ;;  %s2089_s16 = scalar_lea.sflag [#allocation3], %s386_s10  ;;  %s2087_s29 = int_to_ptr.vmem [resolvable:$true] %s397_s29 }
  0x9a   : > { %s1686_s30 = scalar_lea.hbm %s2085_s11, 384  ;;  %p1688_p8 = pneg %p2077_p11 }
  0x9b   : > { %p1687_p12 = scmp.ne.s32.totalorder %s2085_s11, %s1686_s30  ;;  %s1691_s28 = scalar_lea.hbm %s2290_s0, 768 }
  0x9c   : > { %p1692_p1 = scmp.lt.u32.totalorder %s2085_s11, %s2290_s0  ;;  %p1693_p3 = scmp.lt.u32.totalorder %s1691_s28, %s1686_s30 }
  0x9d   : > { %p1689_p13 = pnand %p1688_p8, %p1687_p12  ;;  %p1695_p5 = scmp.lt.u32.totalorder %s1686_s30, %s2085_s11 }
  0x9e   : > { %p1694_p2 = por %p1693_p3, %p1692_p1 }
  0x9f   : > { %p1690_p0 = pneg %p1689_p13 }
  0xa0   : > { %p1696_p9 = por %p1695_p5, %p1694_p2 }
  0xa2   : > { %p1697_p4 = pnand %p1696_p9, %p1690_p0 }
  0xa4   : > { %1700 = shalt.err (!%p1697_p4)
}
  0xa5   : > { %s1701_s10 = scalar_lea.vmem %s2087_s29, 384  ;;  %s1811_s15 = smov [#allocation2]  }
  0xa6   : > { %p1702_p12 = scmp.ne.s32.totalorder %s2087_s29, %s1701_s10  ;;  %s1706_s22 = sshll.u32 %s1811_s15, 4  ;;  %s1707_s22 = int_to_ptr.vmem [resolvable:$false] %s1706_s22 }
  0xa7   : > { %s1708_s2 = scalar_lea.vmem %s1707_s22, 768  ;;  %p1709_p6 = scmp.lt.s32.totalorder %s2087_s29, %s1707_s22 }
  0xa8   : > { %p1704_p13 = pnand %p1702_p12, %p1688_p8  ;;  %p1710_p1 = scmp.lt.s32.totalorder %s1708_s2, %s1701_s10 }
  0xaa   : > { %p1705_p10 = pneg %p1704_p13  ;;  %p1711_p3 = por %p1710_p1, %p1709_p6 }
  0xac   : > { %p1712_p2 = pnand %p1711_p3, %p1705_p10 }
  0xae   : > { %1715 = shalt.err (!%p1712_p2)
}
  0xaf   : > { %s1812_s30 = smov 128   ;;  %s1813_s12 = smov 8  }
  0xb0   : > { %1457 = dma.hbm_to_vmem [thread:$0]  (!%p2077_p11), %s2085_s11, 384, %s2087_s29, %s2089_s16, %s1812_s30, %s1812_s30, %s1813_s12  }
  0xb1   : > { %p2322_p8 = scmp.ne.s32.totalorder %s2312_s24, 0 }
  0xb2   : > { %s2120_s25 = sand.u32 (!%p2322_p8), 1, %s1790_s18  }
  0xb3   : > { %409 = sbr.rel (%p2322_p8) target bundleno = 1377 (0x561), region = 64  ;;  %s412_s26 = scalar_lea.sflag (!%p2322_p8), [#allocation3], %s2120_s25 }
  0xb4   : > { %s1413_s28 = smul.u32 (!%p2322_p8), 24, %s2120_s25 }
  0xb6   : > { %s2124_s10 = scalar_lea.vmem (!%p2322_p8), [#allocation2], %s1413_s28 }
  0xba   : > { %1765 = dma.done.wait (%p2063_p7), %s412_s26, 384  }
  0xbb   : > { %1767 = vsyncadd (%p2063_p7), %s412_s26, 4294966912  ;;  %p2323_p6 = scmp.eq.s32.totalorder %s1901_s23, 0 }
  0xbd   : > { %1769 = dma.done.wait (%p2323_p6), [#allocation6], 512   ;;  %p2324_p10 = pmov %p2323_p6 }
  0xbe   : > { %p2325_p11 = pmov %p2323_p6 }
  0xbf   : > { %1771 = vsyncadd (%p2324_p10), [#allocation6], 4294966784 }
  0xc0   : > { %1773 = dma.done.wait (%p2325_p11), [#allocation9], 272   ;;  %p2326_p0 = pmov %p2323_p6 }
  0xc2   : > { %1775 = vsyncadd (%p2326_p0), [#allocation9], 4294967024  ;;  %p2327_p5 = pmov %p2326_p0 }
  0xc3   : > { %p2328_p9 = pmov %p2326_p0 }
  0xc4   : > { %1777 = dma.done.wait (%p2327_p5), [#allocation12], 16  }
  0xc5   : > { %1779 = vsyncadd (%p2328_p9), [#allocation12], 4294967280  ;;  %s2142_s24 = scalar_lea.vmem [#allocation13], %s1413_s28  ;;  %s2144_s1 = smov 0  }
  0xc6 LB: >> { %v1528_v0 = vld [vmem:[#allocation7] sm:$0xff]   ;;  %v1814_v1 = vmov 0.0   ;;  %v1529_v2 = vld [vmem:[#allocation7 + $0x8] sm:$0xff]   ;;  %v1530_v3 = vld [vmem:[#allocation5] sm:$0xff]   ;;  %vm1815_vm0 = vmmov 0   ;;  %s1283_s21 = sshll.u32 %s1802_s1, 3  ;;  %s1802_s1 = sphi %s2144_s1, %s482_s1  }
  0xc7   : >> { %1348 = vmatprep.subr.bf16.mxu1 %v1814_v1  ;;  %1340 = vmatprep.subr.bf16.mxu0 %v1814_v1  ;;  %s484_s11 = scalar_lea.vmem %s2124_s10, %s1283_s21 [#allocation2]  ;;  %vm510_vm1 = vcmask 261120   ;;  %v1531_v5 = vld [vmem:[#allocation5 + $0x8] sm:$0xff]   ;;  %v1288_v7 = vld [vmem:[%s2295_s5] ss:$0 sm:$0xff]  ;;  %v1532_v10 = vld [vmem:[#allocation8] sm:$0xff]   ;;  %vm683_vm2 = vcmask 130048   ;;  %s1122_s28 = scalar_lea.vmem %s2142_s24, %s1283_s21 [#allocation13] }
  0xc8   : >> { %1349 = vmatpush3.bf16.msra.mxu1 %v1528_v0  ;;  %1352 = vmatprep.mubr.msk.bf16.mxu1 %vm1815_vm0, %v1814_v1  ;;  %v485_v4 = vld [vmem:[%s484_s11] sm:$0xff]  ;;  %v1533_v15 = vld [vmem:[#allocation8 + $0x8] sm:$0xff]   ;;  %s1816_s2 = smov 112   ;;  %vm730_vm3 = vcmask 64512   ;;  %vm744_vm4 = vcmask 1043456   ;;  %v1536_v60 = vld [vmem:[%s2297_s7 + $0x8] sm:$0xff]  }
  0xc9   : >> { %1350 = vmatprep.subr.bf16.mxu1 %v1814_v1  ;;  %1344 = vmatprep.mubr.msk.bf16.mxu0 %vm1815_vm0, %v1814_v1  ;;  %v486_v6 = vpack.c.bf16 %v485_v4, %v485_v4  ;;  %v1284_v9 = vld [vmem:[%s2294_s4] ss:$0 sm:$0xff]  ;;  %s2329_s16 = sld [smem:[#allocation21_spill]]  ;;  %s2330_s12 = sld [smem:[#allocation22_spill]] }
  0xca   : >> { %1341 = vmatpush3.bf16.msra.mxu0 %v1530_v3  ;;  %v1292_v32 = vld [vmem:[#allocation10] ss:$0 sm:$0xff]  ;;  %s482_s1 = sadd.s32 1, %s1802_s1  }
  0xcb   : >> { %1342 = vmatprep.subr.bf16.mxu0 %v1814_v1  ;;  %v1534_v57 = vld [vmem:[%s2297_s7] sm:$0xff]   ;;  %p479_p7 = scmp.ge.s32.totalorder %s482_s1, 3  }
  0xcc   : >> { %1351 = vmatpush3.bf16.msra.mxu1 %v1529_v2  ;;  %s1314_s26 = smul.u32 (%p479_p7), 384, %s1901_s23  ;;  %s1138_s11 = sshll.u32 (%p479_p7), %s2142_s24, 4  ;;  %s2246_s11 = int_to_ptr.vmem [resolvable:$true] %s1138_s11 }
  0xcd   : >> { %1364 = vmatprep.subr.bf16.mxu1 %v1814_v1  ;;  %s2331_s22 = sld [smem:[#allocation23_spill]] (%p479_p7)  ;;  %s1125_s21 = scalar_lea.sflag (%p479_p7), [#allocation4], %s2120_s25 }
  0xce   : >> { %1343 = vmatpush3.bf16.msra.mxu0 %v1531_v5  ;;  %s1716_s30 = scalar_lea.vmem (%p479_p7), %s2246_s11, 384  ;;  %p2332_p12 = scmp.ne.s32.totalorder (%p479_p7), %s2319_s14, 0 }
  0xcf   : >> { %1353 = vmatmul.mubr.msk.bf16.vlgmr.msra.gmra.mrb[0].mxu1 %vm510_vm1, %v486_v6  ;;  %1356 = vmatprep.subr.bf16.mxu0 %v1814_v1  ;;  %v1535_v4 = vld [vmem:[%s2329_s16] sm:$0xff]   ;;  %p1717_p4 = scmp.ne.s32.totalorder (%p479_p7), %s2246_s11, %s1716_s30  ;;  %s1817_s10 = smov (%p479_p7), [#allocation13]  }
  0xd0   : >> { %1366 = vmatprep.mubr.msk.bf16.mxu1 %vm1815_vm0, %v1814_v1  ;;  %s1720_s1 = sshll.u32 (%p479_p7), %s1817_s10, 4  ;;  %s1721_s1 = int_to_ptr.vmem [resolvable:$false] %s1720_s1 }
  0xd1   : >> { %1345 = vmatmul.mubr.msk.bf16.vlgmr.msra.gmra.mrb[0].mxu0 %vm510_vm1, %v486_v6  ;;  %p1718_p13 = pnand (%p479_p7), %p1717_p4, %p2332_p12  ;;  %s1722_s23 = scalar_lea.vmem (%p479_p7), %s1721_s1, 768 }
  0xd2   : >> { %1360 = vmatprep.mubr.msk.bf16.mxu0 %vm1815_vm0, %v1814_v1  ;;  %1357 = vmatpush3.bf16.msra.mxu0 %v1532_v10  ;;  %p1723_p3 = scmp.lt.s32.totalorder (%p479_p7), %s2246_s11, %s1721_s1  ;;  %p1724_p2 = scmp.lt.s32.totalorder (%p479_p7), %s1722_s23, %s1716_s30 }
  0xd3   : >> { %1358 = vmatprep.subr.bf16.mxu0 %v1814_v1  ;;  %p1719_p1 = pneg (%p479_p7), %p1718_p13 }
  0xd4   : > { %p1725_p8 = por (%p479_p7), %p1724_p2, %p1723_p3 }
  0xd6   : >> { %1359 = vmatpush3.bf16.msra.mxu0 %v1533_v15  ;;  %p1726_p6 = pnand (%p479_p7), %p1725_p8, %p1719_p1 }
  0xd7   : >> { %1370 = vmatprep.subr.bf16.mxu0 %v1814_v1 }
  0xd9   : >> { %1361 = vmatmul.mubr.msk.bf16.vlgmr.msra.gmra.mrb[4].mxu0 %vm510_vm1, %v486_v6 }
  0xda   : >> { %1372 = vmatprep.mubr.msk.bf16.mxu0 %vm1815_vm0, %v1814_v1 }
 0x1a2   : >> { %v612_v8 = vpop.f32.mrb[0].mxu1 }
 0x1a3   : >> { %v613_v11 = vadd.f32 %v1288_v7, %v612_v8  ;;  %v1354_v12 = vpop.f32.mrb[1].mxu1 }
 0x1a4   : >> { %v615_v13 = vpop.f32.mrb[2].mxu1  ;;  %v548_v14 = vpop.f32.mrb[0].mxu0 }
 0x1a5   : >> { %v618_v16 = vpack.c.bf16 %v613_v11, %v613_v11  ;;  %v1355_v17 = vpop.f32.mrb[3].mxu1  ;;  %v549_v18 = vadd.f32 %v1284_v9, %v548_v14  ;;  %v1346_v19 = vpop.f32.mrb[1].mxu0  ;;  %v1537_v13 = vld [vmem:[%s2329_s16 + $0x8] sm:$0xff]  }
 0x1a6   : >> { %v551_v20 = vpop.f32.mrb[2].mxu0 }
 0x1a7   : >> { %v688_v21 = vsel %vm683_vm2, %v618_v16, 0  ;;  %799 = vrot.lane.b32.xlu0 %v618_v16, %s1816_s2  ;;  %v554_v22 = vpack.c.bf16 %v549_v18, %v549_v18  ;;  %v1347_v23 = vpop.f32.mrb[3].mxu0 }
 0x1a8   : >> { %1365 = vmatpush3.bf16.xpose.msra.mxu1 %v688_v21 }
 0x1a9   : >> { %1376 = vmatprep.subr.bf16.mxu1 %v1814_v1 }
 0x1ab   : >> { %796 = vrot.lane.b32.xlu0 %v554_v22, %s1816_s2 }
 0x1ac   : >> { %v676_v33 = vpop.f32.mrb[4].mxu0 }
 0x1ad   : >> { %v677_v34 = vadd.f32 %v1292_v32, %v676_v33  ;;  %v1362_v35 = vpop.f32.mrb[5].mxu0 }
 0x1ae   : >> { %v679_v36 = vpop.f32.mrb[6].mxu0 }
 0x1af   : >> { %1367 = vmatmul.mubr.msk.bf16.vlgmr.msra.gmra.mrb[4].mxu1 %vm683_vm2, %v554_v22  ;;  %v682_v37 = vpack.c.bf16 %v677_v34, %v677_v34  ;;  %v1363_v38 = vpop.f32.mrb[7].mxu0 }
 0x1b0   : >> { %1378 = vmatprep.mubr.msk.bf16.mxu1 %vm1815_vm0, %v1814_v1 }
 0x1b1   : >> { %v746_v39 = vsel %vm744_vm4, %v682_v37, 0  ;;  %858 = vrot.lane.b32.xlu0 %v682_v37, %s1816_s2  ;;  %s2244_s2 = scalar_lea.hbm (%p479_p7), %s2331_s22, %s1314_s26 }
 0x1b2   : >> { %1371 = vmatpush3.bf16.msra.mxu0 %v746_v39 }
 0x1b3   : >> { %1382 = vmatprep.subr.bf16.mxu0 %v1814_v1 }
 0x219   : >> { %v800_v24 = vpop.permute.xlu0 %799 }
 0x21a   : >> { %v805_v25 = vsel %vm683_vm2, %v800_v24, 0 }
 0x21b   : >> { %1377 = vmatpush3.bf16.xpose.msra.mxu1 %v805_v25 }
 0x21c   : >> { %1388 = vmatprep.subr.bf16.mxu1 %v1814_v1 }
 0x21d   : >> { %v797_v26 = vpop.permute.xlu0 %796 }
 0x222   : >> { %1379 = vmatmul.mubr.msk.bf16.vlgmr.msra.gmra.mrb[8].mxu1 %vm683_vm2, %v797_v26 }
 0x223   : >> { %1390 = vmatprep.mubr.msk.bf16.mxu1 %vm1815_vm0, %v1814_v1  ;;  %v859_v48 = vpop.permute.xlu0 %858  ;;  %1389 = vmatpush3.bf16.msra.mxu1 %v1536_v60 }
 0x224   : >> { %v864_v52 = vsel %vm744_vm4, %v859_v48, 0  ;;  %1400 = vmatprep.subr.bf16.mxu1 %v1814_v1 }
 0x282   : >> { %v724_v27 = vpop.f32.mrb[4].mxu1 }
 0x283   : >> { %v1368_v28 = vpop.f32.mrb[5].mxu1  ;;  %v731_v29 = vsel %vm730_vm3, %v724_v27, -inf }
 0x284   : >> { %732 = vmax.xlane.f32.xlu1 %v731_v29  ;;  %v727_v30 = vpop.f32.mrb[6].mxu1  ;;  %v1308_v29 = vld [vmem:[#allocation11] ss:$0 sm:$0xff] }
 0x285   : >> { %v1369_v31 = vpop.f32.mrb[7].mxu1 }
 0x2f5   : >> { %v841_v40 = vpop.f32.mrb[8].mxu1 }
 0x2f6   : >> { %v1380_v41 = vpop.f32.mrb[9].mxu1  ;;  %v847_v42 = vsel %vm730_vm3, %v841_v40, -inf }
 0x2f7   : >> { %848 = vmax.xlane.f32.xlu1 %v847_v42  ;;  %v844_v43 = vpop.f32.mrb[10].mxu1 }
 0x2f8   : >> { %v1381_v44 = vpop.f32.mrb[11].mxu1 }
 0x311   : >> { %v733_v45 = vpop.xlane.xlu1 %732 }
 0x312   : >> { %v734_v46 = vsub.f32 %v724_v27, %v733_v45 }
 0x314   : >> { %v735_v47 = vmul.f32 1.442695, %v734_v46 }
 0x316   : >> { %1538 = vpow2.f32 %v735_v47 }
 0x320   : >> { %v1539_v49 = vpop.eup %1538 }
 0x321   : >> { %v737_v50 = vsel %vm730_vm3, %v1539_v49, 0.0  ;;  %v740_v51 = vpack.c.bf16 %v1539_v49, %v1539_v49 }
 0x322   : >> { %738 = vadd.xlane.f32.xlu1 %v737_v50 }
 0x323   : >> { %1373 = vmatmul.mubr.msk.bf16.vlgmr.msra.gmra.mrb[8].mxu0 %vm730_vm3, %v740_v51 }
 0x324   : >> { %1383 = vmatpush3.bf16.msra.mxu0 %v864_v52  ;;  %1384 = vmatprep.mubr.msk.bf16.mxu0 %vm1815_vm0, %v1814_v1 }
 0x325   : >> { %1394 = vmatprep.subr.bf16.mxu0 %v1814_v1 }
 0x384   : >> { %v849_v53 = vpop.xlane.xlu1 %848 }
 0x385   : >> { %v850_v54 = vsub.f32 %v841_v40, %v849_v53 }
 0x387   : >> { %v851_v55 = vmul.f32 1.442695, %v850_v54 }
 0x389   : >> { %1540 = vpow2.f32 %v851_v55 }
 0x393   : >> { %v1541_v56 = vpop.eup %1540 }
 0x394   : >> { %v853_v58 = vsel %vm730_vm3, %v1541_v56, 0.0  ;;  %v856_v59 = vpack.c.bf16 %v1541_v56, %v1541_v56 }
 0x395   : >> { %854 = vadd.xlane.f32.xlu0 %v853_v58 }
 0x396   : >> { %1385 = vmatmul.mubr.msk.bf16.vlgmr.msra.gmra.mrb[12].mxu0 %vm730_vm3, %v856_v59 }
 0x397   : >> { %1395 = vmatpush3.bf16.msra.mxu0 %v1534_v57  ;;  %1396 = vmatprep.mubr.msk.bf16.mxu0 %vm1815_vm0, %v1814_v1 }
 0x398   : >> { %1406 = vmatprep.subr.bf16.mxu0 %v1814_v1 }
 0x3af   : >> { %v739_v61 = vpop.xlane.xlu1 %738 }
 0x3b0   : >> { %1542 = vrcp.f32 %v739_v61 }
 0x3ba   : >> { %v1543_v62 = vpop.eup %1542 }
 0x3f6   : >> { %v782_v63 = vpop.f32.mrb[8].mxu0 }
 0x3f7   : >> { %v789_v0 = vmul.f32 %v1543_v62, %v782_v63  ;;  %v1374_v2 = vpop.f32.mrb[9].mxu0 }
 0x3f8   : >> { %v785_v3 = vpop.f32.mrb[10].mxu0 }
 0x3f9   : >> { %v790_v5 = vpack.c.bf16 %v789_v0, %v789_v0  ;;  %v1375_v6 = vpop.f32.mrb[11].mxu0 }
 0x3fb   : >> { %1397 = vmatmul.mubr.msk.bf16.vlgmr.msra.gmra.mrb[16].mxu0 %vm683_vm2, %v790_v5 }
 0x3fc   : >> { %1407 = vmatpush3.bf16.msra.mxu0 %v1535_v4  ;;  %1408 = vmatprep.mubr.msk.bf16.mxu0 %vm1815_vm0, %v1814_v1 }
 0x403   : >> { %1409 = vmatmul.mubr.msk.bf16.vlgmr.msra.gmra.mrb[20].mxu0 %vm683_vm2, %v790_v5 }
 0x422   : >> { %v855_v7 = vpop.xlane.xlu0 %854 }
 0x423   : >> { %1544 = vrcp.f32 %v855_v7 }
 0x42d   : >> { %v1545_v8 = vpop.eup %1544 }
 0x469   : >> { %v900_v9 = vpop.f32.mrb[12].mxu0 }
 0x46a   : >> { %v907_v10 = vmul.f32 %v1545_v8, %v900_v9  ;;  %v1386_v11 = vpop.f32.mrb[13].mxu0 }
 0x46b   : >> { %v903_v12 = vpop.f32.mrb[14].mxu0 }
 0x46c   : >> { %v908_v14 = vpack.c.bf16 %v907_v10, %v907_v10  ;;  %v1387_v15 = vpop.f32.mrb[15].mxu0 }
 0x46e   : >> { %1391 = vmatmul.mubr.msk.bf16.vlgmr.msra.gmra.mrb[12].mxu1 %vm683_vm2, %v908_v14 }
 0x46f   : >> { %1401 = vmatpush3.bf16.msra.mxu1 %v1537_v13  ;;  %1402 = vmatprep.mubr.msk.bf16.mxu1 %vm1815_vm0, %v1814_v1  ;;  %v1309_v1 = vld [vmem:[%s2330_s12] ss:$0 sm:$0xff] }
 0x476   : >> { %1403 = vmatmul.mubr.msk.bf16.vlgmr.msra.gmra.mrb[16].mxu1 %vm683_vm2, %v908_v14 }
 0x4ce   : >> { %v1003_v16 = vpop.f32.mrb[16].mxu0 }
 0x4cf   : >> { %v1398_v17 = vpop.f32.mrb[17].mxu0 }
 0x4d0   : >> { %v1006_v18 = vpop.f32.mrb[18].mxu0 }
 0x4d1   : >> { %v1399_v19 = vpop.f32.mrb[19].mxu0 }
 0x4d6   : >> { %v1097_v20 = vpop.f32.mrb[20].mxu0 }
 0x4d7   : >> { %v1410_v21 = vpop.f32.mrb[21].mxu0 }
 0x4d8   : >> { %v1100_v22 = vpop.f32.mrb[22].mxu0 }
 0x4d9   : >> { %v1411_v23 = vpop.f32.mrb[23].mxu0 }
 0x541   : >> { %v954_v24 = vpop.f32.mrb[12].mxu1 }
 0x542   : >> { %v1004_v25 = vadd.f32 %v1003_v16, %v954_v24  ;;  %v1392_v26 = vpop.f32.mrb[13].mxu1 }
 0x543   : >> { %v957_v27 = vpop.f32.mrb[14].mxu1 }
 0x544   : >> { %v1393_v28 = vpop.f32.mrb[15].mxu1  ;;  %v1110_v31 = vadd.f32 %v1308_v29, %v1004_v25 }
 0x546   : >> { %v1119_v37 = vmax.f32 %v1110_v31, 0.0 }
 0x549   : >> { %v1051_v30 = vpop.f32.mrb[16].mxu1 }
 0x54a   : >> { %v1098_v32 = vadd.f32 %v1097_v20, %v1051_v30  ;;  %v1404_v33 = vpop.f32.mrb[17].mxu1 }
 0x54b   : >> { %v1054_v34 = vpop.f32.mrb[18].mxu1 }
 0x54c   : >> { %v1118_v35 = vadd.f32 %v1309_v1, %v1098_v32  ;;  %v1405_v36 = vpop.f32.mrb[19].mxu1  ;;  %481 = sbr.rel (!%p479_p7) target bundleno = 198 (0xc6), region = 138 }
 0x54e   : >> { %v1120_v38 = vmax.f32 %v1118_v35, 0.0 }
 0x550   : >> { %v1121_v39 = vmax.f32 %v1119_v37, %v1120_v38 }
 0x552   : >> { %1123 = vst.msk [vmem:[%s1122_s28] sm:$0xff] %vm510_vm1, %v1121_v39 }
 0x553   : > { %1729 = shalt.err (!%p1726_p6)
}
 0x554   : > { %s1730_s24 = scalar_lea.hbm %s2244_s2, 384  ;;  %s1734_s26 = scalar_lea.hbm %s2331_s22, 768 }
 0x555   : > { %p1731_p10 = scmp.ne.s32.totalorder %s2244_s2, %s1730_s24  ;;  %p1735_p5 = scmp.lt.u32.totalorder %s2244_s2, %s2331_s22 }
 0x556   : > { %p1736_p9 = scmp.lt.u32.totalorder %s1734_s26, %s1730_s24  ;;  %p1738_p4 = scmp.lt.u32.totalorder %s1730_s24, %s2244_s2 }
 0x557   : > { %p1732_p11 = pnand %p1731_p10, %p2332_p12 }
 0x558   : > { %p1737_p7 = por %p1736_p9, %p1735_p5 }
 0x559   : > { %p1733_p0 = pneg %p1732_p11 }
 0x55a   : > { %p1739_p13 = por %p1738_p4, %p1737_p7 }
 0x55c   : > { %p1740_p1 = pnand %p1739_p13, %p1733_p0 }
 0x55e   : > { %1743 = shalt.err (!%p1740_p1)
}
 0x55f   : > { %s1818_s30 = smov 128   ;;  %s1819_s10 = smov 8  }
 0x560   : > { %1436 = dma.vmem_to_hbm [thread:$0]  (%p2332_p12), %s2246_s11, 384, %s2244_s2, %s1125_s21, %s1818_s30, %s1818_s30, %s1819_s10  }
 0x561 PF: > { %s1153_s1 = sand.u32 1, %s1786_s17   ;;  %p2333_p3 = scmp.ne.s32.totalorder %s2320_s13, 0 }
 0x562   : > { %p2334_p2 = scmp.ge.s32.totalorder %s1798_s20, 2  ;;  %s1154_s23 = scalar_lea.sflag [#allocation4], %s1153_s1 }
 0x564   : > { %p1459_p8 = pnand %p2334_p2, %p2333_p3 }
 0x566   : > { %1781 = dma.done.wait (!%p1459_p8), %s1154_s23, 384  }
 0x567   : > { %1783 = vsyncadd (!%p1459_p8), %s1154_s23, 4294966912  ;;  %p27_p6 = scmp.ge.s32.totalorder %s2047_s27, 4   ;;  %s2335_s17 = smov %s1790_s18 }
 0x568   : > { %s2336_s18 = smov %s1794_s19  ;;  %s2337_s19 = smov %s2059_s9 }
 0x569   : > { %s2338_s20 = smov %s2047_s27  ;;  %29 = sbr.rel (!%p27_p6) target bundleno = 14 (0xe), region = 149 }
 0x570   :  { %1159 = vsyncpa [#allocation3], 1 }
 0x571   :  { %1161 = vsyncpa [#allocation3 + $0x1], 1 }
 0x572   :  { %1162 = vsyncpa [#allocation6], 1 }
 0x573   :  { %1163 = vsyncpa [#allocation9], 1 }
 0x574   :  { %1164 = vsyncpa [#allocation12], 1 }
 0x575   :  { %1165 = vsyncpa [#allocation4], 1 }
 0x576   :  { %1167 = vsyncpa [#allocation4 + $0x1], 1 }

// kernel: tpu_custom_call.1
= control target key start
LH: loop header
LB: loop body
LE: loop exit
PB: predicated region body
PF: predicated region fallthrough
CT: control target
= control target key end

     0   :  { %s2290_s0 = inlined_call_operand.hbm [shape: f32[6,8,32], index: 0, kind: input, shape index: {}]   ;;  %s2291_s1 = inlined_call_operand.hbm [shape: bf16[32,32], index: 1, kind: input, shape index: {}]   ;;  %s2292_s2 = inlined_call_operand.hbm [shape: bf16[32,32], index: 2, kind: input, shape index: {}]   ;;  %s2293_s3 = inlined_call_operand.hbm [shape: bf16[32,32], index: 3, kind: input, shape index: {}]   ;;  %s2294_s4 = inlined_call_operand.vmem [shape: f32[1,32], index: 4, kind: input, shape index: {}]   ;;  %s2295_s5 = inlined_call_operand.vmem [shape: f32[1,32], index: 5, kind: input, shape index: {}]   ;;  %s2296_s6 = inlined_call_operand.hbm [shape: f32[1,32], index: 6, kind: input, shape index: {}]   ;;  %s2297_s7 = inlined_call_operand.vmem [shape: bf16[32,32], index: 7, kind: input, shape index: {}]   ;;  %s2298_s8 = inlined_call_operand.hbm [shape: f32[1,32], index: 8, kind: input, shape index: {}]   ;;  %s2299_s9 = inlined_call_operand.vmem [shape: bf16[32,32], index: 9, kind: input, shape index: {}]   ;;  %s2300_s10 = inlined_call_operand.vmem [shape: f32[1,32], index: 10, kind: input, shape index: {}]   ;;  %s2301_s11 = inlined_call_operand.hbm [shape: f32[6,8,32], index: 11, kind: output, shape index: {}]  }
   0x1   :  { %2307 = sst [smem:[#allocation19_spill]] %s2291_s1 }
   0x2   :  { %2308 = sst [smem:[#allocation20_spill]] %s2292_s2 }
   0x3   :  { %2309 = sst [smem:[#allocation21_spill]] %s2299_s9 }
   0x4   :  { %2310 = sst [smem:[#allocation22_spill]] %s2300_s10 }
   0x5   :  { %2311 = sst [smem:[#allocation23_spill]] %s2301_s11 }
   0x6   :  { %16 = vsyncpa [#allocation3], 0 }
   0x7   :  { %18 = vsyncpa [#allocation3 + $0x1], 0 }
   0x8   :  { %19 = vsyncpa [#allocation6], 0 }
   0x9   :  { %20 = vsyncpa [#allocation9], 0 }
   0xa   :  { %21 = vsyncpa [#allocation12], 0 }
   0xb   :  { %22 = vsyncpa [#allocation4], 0 }
   0xc   :  { %24 = vsyncpa [#allocation4 + $0x1], 0  ;;  %s1880_s17 = smov 0   ;;  %s1882_s18 = smov 0  }
   0xd   :  { %s1884_s19 = smov 0   ;;  %s1886_s20 = smov 0  }
   0xe LB: > { %s1804_s21 = smov [#allocation5]   ;;  %s1901_s23 = sadd.s32 4294967295, %s1798_s20   ;;  %s1798_s20 = sphi %s1886_s20, %s2338_s20   ;;  %s1794_s19 = sphi %s1884_s19, %s2337_s19   ;;  %s1790_s18 = sphi %s1882_s18, %s2336_s18   ;;  %s1786_s17 = sphi %s1880_s17, %s2335_s17  }
   0xf   : > { %s309_s22 = sshll.u32 %s1804_s21, 4  ;;  %p1269_p0 = scmp.ge.s32.totalorder %s1798_s20, 1  ;;  %s1906_s22 = int_to_ptr.vmem [resolvable:$true] %s309_s22 }
  0x10   : > { %p2304_p1 = scmp.eq.s32.totalorder %s1901_s23, 0  ;;  %p297_p2 = scmp.lt.s32.totalorder %s1798_s20, 3 }
  0x11   : > { %s1805_s25 = smov [#allocation8]   ;;  %s1806_s28 = smov [#allocation7]  }
  0x12   : > { %p1908_p3 = pnand %p1269_p0, %p297_p2  ;;  %s335_s26 = sshll.u32 %s1805_s25, 4  ;;  %s1921_s26 = int_to_ptr.vmem [resolvable:$true] %s335_s26 }
  0x13   : > { %s322_s29 = sshll.u32 %s1806_s28, 4  ;;  %s2314_s1 = sld [smem:[#allocation19_spill]]  ;;  %s1923_s29 = int_to_ptr.vmem [resolvable:$true] %s322_s29 }
  0x14   : > { %s2312_s24 = scalar_select %p1908_p3, 1, 0 }
  0x15   : > { %p1438_p5 = pneg %p1908_p3 }
  0x17   : > { %p1917_p6 = pnand %p1438_p5, %p2304_p1 }
  0x19   : > { %s1546_s13 = scalar_lea.hbm %s2314_s1, 256  ;;  %p1933_p8 = pneg %p1917_p6 }
  0x1a   : > { %p1547_p7 = scmp.ne.s32.totalorder %s2314_s1, %s1546_s13  ;;  %p1553_p11 = scmp.lt.u32.totalorder %s1546_s13, %s2314_s1 }
  0x1c   : > { %p1549_p9 = pnand %p1933_p8, %p1547_p7 }
  0x1e   : > { %p1550_p10 = pneg %p1549_p9 }
  0x20   : > { %p1555_p12 = pnand %p1553_p11, %p1550_p10 }
  0x22   : > { %1558 = shalt.err (!%p1555_p12)
}
  0x23   : > { %s1559_s28 = scalar_lea.vmem %s1906_s22, 256  ;;  %p1567_p5 = scmp.lt.s32.totalorder %s1906_s22, %s1906_s22 }
  0x24   : > { %p1560_p13 = scmp.ne.s32.totalorder %s1906_s22, %s1559_s28  ;;  %p1568_p4 = scmp.lt.s32.totalorder %s1559_s28, %s1559_s28 }
  0x26   : > { %p1562_p0 = pnand %p1560_p13, %p1933_p8  ;;  %p1569_p7 = por %p1568_p4, %p1567_p5 }
  0x28   : > { %p1563_p2 = pneg %p1562_p0 }
  0x2a   : > { %p1570_p9 = pnand %p1569_p7, %p1563_p2 }
  0x2c   : > { %1573 = shalt.err (!%p1570_p9)
}
  0x2d   : > { %s1807_s30 = smov 64   ;;  %s1808_s12 = smov 4  }
  0x2e   : > { %1441 = dma.hbm_to_vmem [thread:$0]  (!%p1917_p6), %s2314_s1, 256, %s1906_s22, [#allocation6], %s1807_s30, %s1807_s30, %s1808_s12  }
  0x2f   : > { %s1574_s25 = scalar_lea.hbm %s2293_s3, 256 }
  0x30   : > { %p1575_p4 = scmp.ne.s32.totalorder %s2293_s3, %s1574_s25  ;;  %p1581_p12 = scmp.lt.u32.totalorder %s1574_s25, %s2293_s3 }
  0x32   : > { %p1577_p10 = pnand %p1575_p4, %p1933_p8 }
  0x34   : > { %p1578_p11 = pneg %p1577_p10 }
  0x36   : > { %p1583_p13 = pnand %p1581_p12, %p1578_p11 }
  0x38   : > { %1586 = shalt.err (!%p1583_p13)
}
  0x39   : > { %s1587_s22 = scalar_lea.vmem %s1921_s26, 256  ;;  %p1595_p7 = scmp.lt.s32.totalorder %s1921_s26, %s1921_s26 }
  0x3a   : > { %p1588_p0 = scmp.ne.s32.totalorder %s1921_s26, %s1587_s22  ;;  %p1596_p9 = scmp.lt.s32.totalorder %s1587_s22, %s1587_s22 }
  0x3c   : > { %p1590_p2 = pnand %p1588_p0, %p1933_p8  ;;  %p1597_p4 = por %p1596_p9, %p1595_p7 }
  0x3e   : > { %p1591_p5 = pneg %p1590_p2 }
  0x40   : > { %p1598_p10 = pnand %p1597_p4, %p1591_p5 }
  0x42   : > { %1601 = shalt.err (!%p1598_p10)
}
  0x43   : > { %1447 = dma.hbm_to_vmem [thread:$0]  (!%p1917_p6), %s2293_s3, 256, %s1921_s26, [#allocation9], %s1807_s30, %s1807_s30, %s1808_s12  }
  0x44   : > { %s2316_s2 = sld [smem:[#allocation20_spill]] }
  0x4a   : > { %s1602_s14 = scalar_lea.hbm %s2316_s2, 256 }
  0x4b   : > { %p1603_p11 = scmp.ne.s32.totalorder %s2316_s2, %s1602_s14  ;;  %p1609_p0 = scmp.lt.u32.totalorder %s1602_s14, %s2316_s2 }
  0x4d   : > { %p1605_p12 = pnand %p1603_p11, %p1933_p8 }
  0x4f   : > { %p1606_p13 = pneg %p1605_p12 }
  0x51   : > { %p1611_p2 = pnand %p1609_p0, %p1606_p13 }
  0x53   : > { %1614 = shalt.err (!%p1611_p2)
}
  0x54   : > { %s1615_s26 = scalar_lea.vmem %s1923_s29, 256  ;;  %p1623_p4 = scmp.lt.s32.totalorder %s1923_s29, %s1923_s29 }
  0x55   : > { %p1616_p5 = scmp.ne.s32.totalorder %s1923_s29, %s1615_s26  ;;  %p1624_p10 = scmp.lt.s32.totalorder %s1615_s26, %s1615_s26 }
  0x57   : > { %p1618_p7 = pnand %p1616_p5, %p1933_p8  ;;  %p1625_p11 = por %p1624_p10, %p1623_p4 }
  0x59   : > { %p1619_p9 = pneg %p1618_p7 }
  0x5b   : > { %p1626_p12 = pnand %p1625_p11, %p1619_p9 }
  0x5d   : > { %1629 = shalt.err (!%p1626_p12)
}
  0x5e   : > { %1444 = dma.hbm_to_vmem [thread:$0]  (!%p1917_p6), %s2316_s2, 256, %s1923_s29, [#allocation6], %s1807_s30, %s1807_s30, %s1808_s12  }
  0x5f   : > { %s1809_s10 = smov [#allocation10]   ;;  %s1810_s13 = smov [#allocation11]  }
  0x60   : > { %s355_s11 = sshll.u32 %s1809_s10, 4  ;;  %s369_s14 = sshll.u32 %s1810_s13, 4  ;;  %s356_s11 = int_to_ptr.vmem [resolvable:$true] %s355_s11  ;;  %s370_s14 = int_to_ptr.vmem [resolvable:$true] %s369_s14 }
  0x61   : > { %s1630_s25 = scalar_lea.hbm %s2296_s6, 16 }
  0x62   : > { %p1631_p13 = scmp.ne.s32.totalorder %s2296_s6, %s1630_s25  ;;  %p1637_p5 = scmp.lt.u32.totalorder %s1630_s25, %s2296_s6 }
  0x64   : > { %p1633_p0 = pnand %p1631_p13, %p1933_p8 }
  0x66   : > { %p1634_p2 = pneg %p1633_p0 }
  0x68   : > { %p1639_p7 = pnand %p1637_p5, %p1634_p2 }
  0x6a   : > { %1642 = shalt.err (!%p1639_p7)
}
  0x6b   : > { %s1643_s29 = scalar_lea.vmem %s356_s11, 16  ;;  %s1650_s30 = scalar_lea.vmem %s356_s11, 32 }
  0x6c   : > { %p1644_p9 = scmp.ne.s32.totalorder %s356_s11, %s1643_s29  ;;  %p1651_p11 = scmp.lt.s32.totalorder %s356_s11, %s356_s11 }
  0x6d   : > { %p1652_p12 = scmp.lt.s32.totalorder %s1650_s30, %s1643_s29 }
  0x6e   : > { %p1646_p4 = pnand %p1644_p9, %p1933_p8 }
  0x6f   : > { %p1653_p1 = por %p1652_p12, %p1651_p11 }
  0x70   : > { %p1647_p10 = pneg %p1646_p4 }
  0x72   : > { %p1654_p3 = pnand %p1653_p1, %p1647_p10 }
  0x74   : > { %1657 = shalt.err (!%p1654_p3)
}
  0x75   : > { %1450 = dma.hbm_to_vmem [thread:$0]  (!%p1917_p6), %s2296_s6, 16, %s356_s11, [#allocation9]  }
  0x76   : > { %s1658_s13 = scalar_lea.hbm %s2298_s8, 16 }
  0x77   : > { %p1659_p13 = scmp.ne.s32.totalorder %s2298_s8, %s1658_s13  ;;  %p1665_p3 = scmp.lt.u32.totalorder %s1658_s13, %s2298_s8 }
  0x79   : > { %p1661_p0 = pnand %p1659_p13, %p1933_p8 }
  0x7b   : > { %p1662_p1 = pneg %p1661_p0 }
  0x7d   : > { %p1667_p2 = pnand %p1665_p3, %p1662_p1 }
  0x7f   : > { %1670 = shalt.err (!%p1667_p2)
}
  0x80   : > { %s1671_s26 = scalar_lea.vmem %s370_s14, 16  ;;  %s1678_s11 = scalar_lea.vmem %s370_s14, 32 }
  0x81   : > { %p1672_p5 = scmp.ne.s32.totalorder %s370_s14, %s1671_s26  ;;  %p1679_p4 = scmp.lt.s32.totalorder %s370_s14, %s370_s14 }
  0x82   : > { %p1680_p10 = scmp.lt.s32.totalorder %s1678_s11, %s1671_s26 }
  0x83   : > { %p1674_p7 = pnand %p1672_p5, %p1933_p8 }
  0x84   : > { %p1681_p11 = por %p1680_p10, %p1679_p4 }
  0x85   : > { %p1675_p9 = pneg %p1674_p7 }
  0x87   : > { %p1682_p12 = pnand %p1681_p11, %p1675_p9 }
  0x89   : > { %1685 = shalt.err (!%p1682_p12)
}
  0x8a   : > { %1453 = dma.hbm_to_vmem [thread:$0]  (!%p1917_p6), %s2298_s8, 16, %s370_s14, [#allocation12]  }
  0x8b   : > { %s1268_s16 = sadd.s32 4294967294, %s1798_s20   ;;  %s2047_s27 = sadd.s32 1, %s1798_s20  }
  0x8c   : > { %s37_s30 = sadd.s32 1, %s1794_s19  ;;  %s34_s12 = ssub.s32 %s1798_s20, %s2047_s27 }
  0x8d   : > { %p44_p8 = scmp.ne.s32.totalorder %s1794_s19, %s1790_s18  ;;  %p35_p13 = scmp.eq.s32.totalorder %s34_s12, 0 }
  0x8e   : > { %p45_p0 = scmp.eq.s32.totalorder %s1798_s20, 0  ;;  %p50_p1 = scmp.ne.s32.totalorder %s1790_s18, %s1786_s17 }
  0x8f   : > { %p284_p3 = scmp.eq.s32.totalorder %s1901_s23, 1  ;;  %p2317_p5 = scmp.eq.s32.totalorder %s1901_s23, 0 }
  0x90   : > { %s2059_s9 = scalar_select %p35_p13, %s1794_s19, %s37_s30  }
  0x91   : > { %p46_p2 = por %p45_p0, %p44_p8  ;;  %p2063_p7 = por %p2317_p5, %p50_p1 }
  0x92   : > { %p2067_p6 = por %p284_p3, %p44_p8  ;;  %p290_p9 = scmp.eq.s32.totalorder %s1268_s16, 1 }
  0x93   : > { %p1467_p4 = scmp.lt.s32.totalorder %s1798_s20, 2  ;;  %s386_s10 = sand.u32 1, %s1794_s19  }
  0x94   : > { %s2319_s14 = scalar_select %p2067_p6, 1, 0 }
  0x95   : > { %p2073_p10 = por %p290_p9, %p50_p1  ;;  %s1412_s15 = smul.u32 24, %s386_s10 }
  0x96   : > { %p2077_p11 = pnand %p1467_p4, %p46_p2  ;;  %s1313_s25 = smul.u32 384, %s1798_s20 }
  0x97   : > { %s2320_s13 = scalar_select %p2073_p10, 1, 0 }
  0x98   : > { %s2085_s11 = scalar_lea.hbm %s2290_s0, %s1313_s25  ;;  %s390_s22 = scalar_lea.vmem [#allocation2], %s1412_s15 }
  0x99   : > { %s397_s29 = sshll.u32 %s390_s22, 4  ;;  %s2089_s16 = scalar_lea.sflag [#allocation3], %s386_s10  ;;  %s2087_s29 = int_to_ptr.vmem [resolvable:$true] %s397_s29 }
  0x9a   : > { %s1686_s30 = scalar_lea.hbm %s2085_s11, 384  ;;  %p1688_p8 = pneg %p2077_p11 }
  0x9b   : > { %p1687_p12 = scmp.ne.s32.totalorder %s2085_s11, %s1686_s30  ;;  %s1691_s28 = scalar_lea.hbm %s2290_s0, 768 }
  0x9c   : > { %p1692_p1 = scmp.lt.u32.totalorder %s2085_s11, %s2290_s0  ;;  %p1693_p3 = scmp.lt.u32.totalorder %s1691_s28, %s1686_s30 }
  0x9d   : > { %p1689_p13 = pnand %p1688_p8, %p1687_p12  ;;  %p1695_p5 = scmp.lt.u32.totalorder %s1686_s30, %s2085_s11 }
  0x9e   : > { %p1694_p2 = por %p1693_p3, %p1692_p1 }
  0x9f   : > { %p1690_p0 = pneg %p1689_p13 }
  0xa0   : > { %p1696_p9 = por %p1695_p5, %p1694_p2 }
  0xa2   : > { %p1697_p4 = pnand %p1696_p9, %p1690_p0 }
  0xa4   : > { %1700 = shalt.err (!%p1697_p4)
}
  0xa5   : > { %s1701_s10 = scalar_lea.vmem %s2087_s29, 384  ;;  %s1811_s15 = smov [#allocation2]  }
  0xa6   : > { %p1702_p12 = scmp.ne.s32.totalorder %s2087_s29, %s1701_s10  ;;  %s1706_s22 = sshll.u32 %s1811_s15, 4  ;;  %s1707_s22 = int_to_ptr.vmem [resolvable:$false] %s1706_s22 }
  0xa7   : > { %s1708_s2 = scalar_lea.vmem %s1707_s22, 768  ;;  %p1709_p6 = scmp.lt.s32.totalorder %s2087_s29, %s1707_s22 }
  0xa8   : > { %p1704_p13 = pnand %p1702_p12, %p1688_p8  ;;  %p1710_p1 = scmp.lt.s32.totalorder %s1708_s2, %s1701_s10 }
  0xaa   : > { %p1705_p10 = pneg %p1704_p13  ;;  %p1711_p3 = por %p1710_p1, %p1709_p6 }
  0xac   : > { %p1712_p2 = pnand %p1711_p3, %p1705_p10 }
  0xae   : > { %1715 = shalt.err (!%p1712_p2)
}
  0xaf   : > { %s1812_s30 = smov 128   ;;  %s1813_s12 = smov 8  }
  0xb0   : > { %1457 = dma.hbm_to_vmem [thread:$0]  (!%p2077_p11), %s2085_s11, 384, %s2087_s29, %s2089_s16, %s1812_s30, %s1812_s30, %s1813_s12  }
  0xb1   : > { %p2322_p8 = scmp.ne.s32.totalorder %s2312_s24, 0 }
  0xb2   : > { %s2120_s25 = sand.u32 (!%p2322_p8), 1, %s1790_s18  }
  0xb3   : > { %409 = sbr.rel (%p2322_p8) target bundleno = 1377 (0x561), region = 64  ;;  %s412_s26 = scalar_lea.sflag (!%p2322_p8), [#allocation3], %s2120_s25 }
  0xb4   : > { %s1413_s28 = smul.u32 (!%p2322_p8), 24, %s2120_s25 }
  0xb6   : > { %s2124_s10 = scalar_lea.vmem (!%p2322_p8), [#allocation2], %s1413_s28 }
  0xba   : > { %1765 = dma.done.wait (%p2063_p7), %s412_s26, 384  }
  0xbb   : > { %1767 = vsyncadd (%p2063_p7), %s412_s26, 4294966912  ;;  %p2323_p6 = scmp.eq.s32.totalorder %s1901_s23, 0 }
  0xbd   : > { %1769 = dma.done.wait (%p2323_p6), [#allocation6], 512   ;;  %p2324_p10 = pmov %p2323_p6 }
  0xbe   : > { %p2325_p11 = pmov %p2323_p6 }
  0xbf   : > { %1771 = vsyncadd (%p2324_p10), [#allocation6], 4294966784 }
  0xc0   : > { %1773 = dma.done.wait (%p2325_p11), [#allocation9], 272   ;;  %p2326_p0 = pmov %p2323_p6 }
  0xc2   : > { %1775 = vsyncadd (%p2326_p0), [#allocation9], 4294967024  ;;  %p2327_p5 = pmov %p2326_p0 }
  0xc3   : > { %p2328_p9 = pmov %p2326_p0 }
  0xc4   : > { %1777 = dma.done.wait (%p2327_p5), [#allocation12], 16  }
  0xc5   : > { %1779 = vsyncadd (%p2328_p9), [#allocation12], 4294967280  ;;  %s2142_s24 = scalar_lea.vmem [#allocation13], %s1413_s28  ;;  %s2144_s1 = smov 0  }
  0xc6 LB: >> { %v1528_v0 = vld [vmem:[#allocation7] sm:$0xff]   ;;  %v1814_v1 = vmov 0.0   ;;  %v1529_v2 = vld [vmem:[#allocation7 + $0x8] sm:$0xff]   ;;  %v1530_v3 = vld [vmem:[#allocation5] sm:$0xff]   ;;  %vm1815_vm0 = vmmov 0   ;;  %s1283_s21 = sshll.u32 %s1802_s1, 3  ;;  %s1802_s1 = sphi %s2144_s1, %s482_s1  }
  0xc7   : >> { %1348 = vmatprep.subr.bf16.mxu1 %v1814_v1  ;;  %1340 = vmatprep.subr.bf16.mxu0 %v1814_v1  ;;  %s484_s11 = scalar_lea.vmem %s2124_s10, %s1283_s21 [#allocation2]  ;;  %vm510_vm1 = vcmask 261120   ;;  %v1531_v5 = vld [vmem:[#allocation5 + $0x8] sm:$0xff]   ;;  %v1288_v7 = vld [vmem:[%s2295_s5] ss:$0 sm:$0xff]  ;;  %v1532_v10 = vld [vmem:[#allocation8] sm:$0xff]   ;;  %vm683_vm2 = vcmask 130048   ;;  %s1122_s28 = scalar_lea.vmem %s2142_s24, %s1283_s21 [#allocation13] }
  0xc8   : >> { %1349 = vmatpush3.bf16.msra.mxu1 %v1528_v0  ;;  %1352 = vmatprep.mubr.msk.bf16.mxu1 %vm1815_vm0, %v1814_v1  ;;  %v485_v4 = vld [vmem:[%s484_s11] sm:$0xff]  ;;  %v1533_v15 = vld [vmem:[#allocation8 + $0x8] sm:$0xff]   ;;  %s1816_s2 = smov 112   ;;  %vm730_vm3 = vcmask 64512   ;;  %vm744_vm4 = vcmask 1043456   ;;  %v1536_v60 = vld [vmem:[%s2297_s7 + $0x8] sm:$0xff]  }
  0xc9   : >> { %1350 = vmatprep.subr.bf16.mxu1 %v1814_v1  ;;  %1344 = vmatprep.mubr.msk.bf16.mxu0 %vm1815_vm0, %v1814_v1  ;;  %v486_v6 = vpack.c.bf16 %v485_v4, %v485_v4  ;;  %v1284_v9 = vld [vmem:[%s2294_s4] ss:$0 sm:$0xff]  ;;  %s2329_s16 = sld [smem:[#allocation21_spill]]  ;;  %s2330_s12 = sld [smem:[#allocation22_spill]] }
  0xca   : >> { %1341 = vmatpush3.bf16.msra.mxu0 %v1530_v3  ;;  %v1292_v32 = vld [vmem:[#allocation10] ss:$0 sm:$0xff]  ;;  %s482_s1 = sadd.s32 1, %s1802_s1  }
  0xcb   : >> { %1342 = vmatprep.subr.bf16.mxu0 %v1814_v1  ;;  %v1534_v57 = vld [vmem:[%s2297_s7] sm:$0xff]   ;;  %p479_p7 = scmp.ge.s32.totalorder %s482_s1, 3  }
  0xcc   : >> { %1351 = vmatpush3.bf16.msra.mxu1 %v1529_v2  ;;  %s1314_s26 = smul.u32 (%p479_p7), 384, %s1901_s23  ;;  %s1138_s11 = sshll.u32 (%p479_p7), %s2142_s24, 4  ;;  %s2246_s11 = int_to_ptr.vmem [resolvable:$true] %s1138_s11 }
  0xcd   : >> { %1364 = vmatprep.subr.bf16.mxu1 %v1814_v1  ;;  %s2331_s22 = sld [smem:[#allocation23_spill]] (%p479_p7)  ;;  %s1125_s21 = scalar_lea.sflag (%p479_p7), [#allocation4], %s2120_s25 }
  0xce   : >> { %1343 = vmatpush3.bf16.msra.mxu0 %v1531_v5  ;;  %s1716_s30 = scalar_lea.vmem (%p479_p7), %s2246_s11, 384  ;;  %p2332_p12 = scmp.ne.s32.totalorder (%p479_p7), %s2319_s14, 0 }
  0xcf   : >> { %1353 = vmatmul.mubr.msk.bf16.vlgmr.msra.gmra.mrb[0].mxu1 %vm510_vm1, %v486_v6  ;;  %1356 = vmatprep.subr.bf16.mxu0 %v1814_v1  ;;  %v1535_v4 = vld [vmem:[%s2329_s16] sm:$0xff]   ;;  %p1717_p4 = scmp.ne.s32.totalorder (%p479_p7), %s2246_s11, %s1716_s30  ;;  %s1817_s10 = smov (%p479_p7), [#allocation13]  }
  0xd0   : >> { %1366 = vmatprep.mubr.msk.bf16.mxu1 %vm1815_vm0, %v1814_v1  ;;  %s1720_s1 = sshll.u32 (%p479_p7), %s1817_s10, 4  ;;  %s1721_s1 = int_to_ptr.vmem [resolvable:$false] %s1720_s1 }
  0xd1   : >> { %1345 = vmatmul.mubr.msk.bf16.vlgmr.msra.gmra.mrb[0].mxu0 %vm510_vm1, %v486_v6  ;;  %p1718_p13 = pnand (%p479_p7), %p1717_p4, %p2332_p12  ;;  %s1722_s23 = scalar_lea.vmem (%p479_p7), %s1721_s1, 768 }
  0xd2   : >> { %1360 = vmatprep.mubr.msk.bf16.mxu0 %vm1815_vm0, %v1814_v1  ;;  %1357 = vmatpush3.bf16.msra.mxu0 %v1532_v10  ;;  %p1723_p3 = scmp.lt.s32.totalorder (%p479_p7), %s2246_s11, %s1721_s1  ;;  %p1724_p2 = scmp.lt.s32.totalorder (%p479_p7), %s1722_s23, %s1716_s30 }
  0xd3   : >> { %1358 = vmatprep.subr.bf16.mxu0 %v1814_v1  ;;  %p1719_p1 = pneg (%p479_p7), %p1718_p13 }
  0xd4   : > { %p1725_p8 = por (%p479_p7), %p1724_p2, %p1723_p3 }
  0xd6   : >> { %1359 = vmatpush3.bf16.msra.mxu0 %v1533_v15  ;;  %p1726_p6 = pnand (%p479_p7), %p1725_p8, %p1719_p1 }
  0xd7   : >> { %1370 = vmatprep.subr.bf16.mxu0 %v1814_v1 }
  0xd9   : >> { %1361 = vmatmul.mubr.msk.bf16.vlgmr.msra.gmra.mrb[4].mxu0 %vm510_vm1, %v486_v6 }
  0xda   : >> { %1372 = vmatprep.mubr.msk.bf16.mxu0 %vm1815_vm0, %v1814_v1 }
 0x1a2   : >> { %v612_v8 = vpop.f32.mrb[0].mxu1 }
 0x1a3   : >> { %v613_v11 = vadd.f32 %v1288_v7, %v612_v8  ;;  %v1354_v12 = vpop.f32.mrb[1].mxu1 }
 0x1a4   : >> { %v615_v13 = vpop.f32.mrb[2].mxu1  ;;  %v548_v14 = vpop.f32.mrb[0].mxu0 }
 0x1a5   : >> { %v618_v16 = vpack.c.bf16 %v613_v11, %v613_v11  ;;  %v1355_v17 = vpop.f32.mrb[3].mxu1  ;;  %v549_v18 = vadd.f32 %v1284_v9, %v548_v14  ;;  %v1346_v19 = vpop.f32.mrb[1].mxu0  ;;  %v1537_v13 = vld [vmem:[%s2329_s16 + $0x8] sm:$0xff]  }
 0x1a6   : >> { %v551_v20 = vpop.f32.mrb[2].mxu0 }
 0x1a7   : >> { %v688_v21 = vsel %vm683_vm2, %v618_v16, 0  ;;  %799 = vrot.lane.b32.xlu0 %v618_v16, %s1816_s2  ;;  %v554_v22 = vpack.c.bf16 %v549_v18, %v549_v18  ;;  %v1347_v23 = vpop.f32.mrb[3].mxu0 }
 0x1a8   : >> { %1365 = vmatpush3.bf16.xpose.msra.mxu1 %v688_v21 }
 0x1a9   : >> { %1376 = vmatprep.subr.bf16.mxu1 %v1814_v1 }
 0x1ab   : >> { %796 = vrot.lane.b32.xlu0 %v554_v22, %s1816_s2 }
 0x1ac   : >> { %v676_v33 = vpop.f32.mrb[4].mxu0 }
 0x1ad   : >> { %v677_v34 = vadd.f32 %v1292_v32, %v676_v33  ;;  %v1362_v35 = vpop.f32.mrb[5].mxu0 }
 0x1ae   : >> { %v679_v36 = vpop.f32.mrb[6].mxu0 }
 0x1af   : >> { %1367 = vmatmul.mubr.msk.bf16.vlgmr.msra.gmra.mrb[4].mxu1 %vm683_vm2, %v554_v22  ;;  %v682_v37 = vpack.c.bf16 %v677_v34, %v677_v34  ;;  %v1363_v38 = vpop.f32.mrb[7].mxu0 }
 0x1b0   : >> { %1378 = vmatprep.mubr.msk.bf16.mxu1 %vm1815_vm0, %v1814_v1 }
 0x1b1   : >> { %v746_v39 = vsel %vm744_vm4, %v682_v37, 0  ;;  %858 = vrot.lane.b32.xlu0 %v682_v37, %s1816_s2  ;;  %s2244_s2 = scalar_lea.hbm (%p479_p7), %s2331_s22, %s1314_s26 }
 0x1b2   : >> { %1371 = vmatpush3.bf16.msra.mxu0 %v746_v39 }
 0x1b3   : >> { %1382 = vmatprep.subr.bf16.mxu0 %v1814_v1 }
 0x219   : >> { %v800_v24 = vpop.permute.xlu0 %799 }
 0x21a   : >> { %v805_v25 = vsel %vm683_vm2, %v800_v24, 0 }
 0x21b   : >> { %1377 = vmatpush3.bf16.xpose.msra.mxu1 %v805_v25 }
 0x21c   : >> { %1388 = vmatprep.subr.bf16.mxu1 %v1814_v1 }
 0x21d   : >> { %v797_v26 = vpop.permute.xlu0 %796 }
 0x222   : >> { %1379 = vmatmul.mubr.msk.bf16.vlgmr.msra.gmra.mrb[8].mxu1 %vm683_vm2, %v797_v26 }
 0x223   : >> { %1390 = vmatprep.mubr.msk.bf16.mxu1 %vm1815_vm0, %v1814_v1  ;;  %v859_v48 = vpop.permute.xlu0 %858  ;;  %1389 = vmatpush3.bf16.msra.mxu1 %v1536_v60 }
 0x224   : >> { %v864_v52 = vsel %vm744_vm4, %v859_v48, 0  ;;  %1400 = vmatprep.subr.bf16.mxu1 %v1814_v1 }
 0x282   : >> { %v724_v27 = vpop.f32.mrb[4].mxu1 }
 0x283   : >> { %v1368_v28 = vpop.f32.mrb[5].mxu1  ;;  %v731_v29 = vsel %vm730_vm3, %v724_v27, -inf }
 0x284   : >> { %732 = vmax.xlane.f32.xlu1 %v731_v29  ;;  %v727_v30 = vpop.f32.mrb[6].mxu1  ;;  %v1308_v29 = vld [vmem:[#allocation11] ss:$0 sm:$0xff] }
 0x285   : >> { %v1369_v31 = vpop.f32.mrb[7].mxu1 }
 0x2f5   : >> { %v841_v40 = vpop.f32.mrb[8].mxu1 }
 0x2f6   : >> { %v1380_v41 = vpop.f32.mrb[9].mxu1  ;;  %v847_v42 = vsel %vm730_vm3, %v841_v40, -inf }
 0x2f7   : >> { %848 = vmax.xlane.f32.xlu1 %v847_v42  ;;  %v844_v43 = vpop.f32.mrb[10].mxu1 }
 0x2f8   : >> { %v1381_v44 = vpop.f32.mrb[11].mxu1 }
 0x311   : >> { %v733_v45 = vpop.xlane.xlu1 %732 }
 0x312   : >> { %v734_v46 = vsub.f32 %v724_v27, %v733_v45 }
 0x314   : >> { %v735_v47 = vmul.f32 1.442695, %v734_v46 }
 0x316   : >> { %1538 = vpow2.f32 %v735_v47 }
 0x320   : >> { %v1539_v49 = vpop.eup %1538 }
 0x321   : >> { %v737_v50 = vsel %vm730_vm3, %v1539_v49, 0.0  ;;  %v740_v51 = vpack.c.bf16 %v1539_v49, %v1539_v49 }
 0x322   : >> { %738 = vadd.xlane.f32.xlu1 %v737_v50 }
 0x323   : >> { %1373 = vmatmul.mubr.msk.bf16.vlgmr.msra.gmra.mrb[8].mxu0 %vm730_vm3, %v740_v51 }
 0x324   : >> { %1383 = vmatpush3.bf16.msra.mxu0 %v864_v52  ;;  %1384 = vmatprep.mubr.msk.bf16.mxu0 %vm1815_vm0, %v1814_v1 }
 0x325   : >> { %1394 = vmatprep.subr.bf16.mxu0 %v1814_v1 }
 0x384   : >> { %v849_v53 = vpop.xlane.xlu1 %848 }
 0x385   : >> { %v850_v54 = vsub.f32 %v841_v40, %v849_v53 }
 0x387   : >> { %v851_v55 = vmul.f32 1.442695, %v850_v54 }
 0x389   : >> { %1540 = vpow2.f32 %v851_v55 }
 0x393   : >> { %v1541_v56 = vpop.eup %1540 }
 0x394   : >> { %v853_v58 = vsel %vm730_vm3, %v1541_v56, 0.0  ;;  %v856_v59 = vpack.c.bf16 %v1541_v56, %v1541_v56 }
 0x395   : >> { %854 = vadd.xlane.f32.xlu0 %v853_v58 }
 0x396   : >> { %1385 = vmatmul.mubr.msk.bf16.vlgmr.msra.gmra.mrb[12].mxu0 %vm730_vm3, %v856_v59 }
 0x397   : >> { %1395 = vmatpush3.bf16.msra.mxu0 %v1534_v57  ;;  %1396 = vmatprep.mubr.msk.bf16.mxu0 %vm1815_vm0, %v1814_v1 }
 0x398   : >> { %1406 = vmatprep.subr.bf16.mxu0 %v1814_v1 }
 0x3af   : >> { %v739_v61 = vpop.xlane.xlu1 %738 }
 0x3b0   : >> { %1542 = vrcp.f32 %v739_v61 }
 0x3ba   : >> { %v1543_v62 = vpop.eup %1542 }
 0x3f6   : >> { %v782_v63 = vpop.f32.mrb[8].mxu0 }
 0x3f7   : >> { %v789_v0 = vmul.f32 %v1543_v62, %v782_v63  ;;  %v1374_v2 = vpop.f32.mrb[9].mxu0 }
 0x3f8   : >> { %v785_v3 = vpop.f32.mrb[10].mxu0 }
 0x3f9   : >> { %v790_v5 = vpack.c.bf16 %v789_v0, %v789_v0  ;;  %v1375_v6 = vpop.f32.mrb[11].mxu0 }
 0x3fb   : >> { %1397 = vmatmul.mubr.msk.bf16.vlgmr.msra.gmra.mrb[16].mxu0 %vm683_vm2, %v790_v5 }
 0x3fc   : >> { %1407 = vmatpush3.bf16.msra.mxu0 %v1535_v4  ;;  %1408 = vmatprep.mubr.msk.bf16.mxu0 %vm1815_vm0, %v1814_v1 }
 0x403   : >> { %1409 = vmatmul.mubr.msk.bf16.vlgmr.msra.gmra.mrb[20].mxu0 %vm683_vm2, %v790_v5 }
 0x422   : >> { %v855_v7 = vpop.xlane.xlu0 %854 }
 0x423   : >> { %1544 = vrcp.f32 %v855_v7 }
 0x42d   : >> { %v1545_v8 = vpop.eup %1544 }
 0x469   : >> { %v900_v9 = vpop.f32.mrb[12].mxu0 }
 0x46a   : >> { %v907_v10 = vmul.f32 %v1545_v8, %v900_v9  ;;  %v1386_v11 = vpop.f32.mrb[13].mxu0 }
 0x46b   : >> { %v903_v12 = vpop.f32.mrb[14].mxu0 }
 0x46c   : >> { %v908_v14 = vpack.c.bf16 %v907_v10, %v907_v10  ;;  %v1387_v15 = vpop.f32.mrb[15].mxu0 }
 0x46e   : >> { %1391 = vmatmul.mubr.msk.bf16.vlgmr.msra.gmra.mrb[12].mxu1 %vm683_vm2, %v908_v14 }
 0x46f   : >> { %1401 = vmatpush3.bf16.msra.mxu1 %v1537_v13  ;;  %1402 = vmatprep.mubr.msk.bf16.mxu1 %vm1815_vm0, %v1814_v1  ;;  %v1309_v1 = vld [vmem:[%s2330_s12] ss:$0 sm:$0xff] }
 0x476   : >> { %1403 = vmatmul.mubr.msk.bf16.vlgmr.msra.gmra.mrb[16].mxu1 %vm683_vm2, %v908_v14 }
 0x4ce   : >> { %v1003_v16 = vpop.f32.mrb[16].mxu0 }
 0x4cf   : >> { %v1398_v17 = vpop.f32.mrb[17].mxu0 }
 0x4d0   : >> { %v1006_v18 = vpop.f32.mrb[18].mxu0 }
 0x4d1   : >> { %v1399_v19 = vpop.f32.mrb[19].mxu0 }
 0x4d6   : >> { %v1097_v20 = vpop.f32.mrb[20].mxu0 }
 0x4d7   : >> { %v1410_v21 = vpop.f32.mrb[21].mxu0 }
 0x4d8   : >> { %v1100_v22 = vpop.f32.mrb[22].mxu0 }
 0x4d9   : >> { %v1411_v23 = vpop.f32.mrb[23].mxu0 }
 0x541   : >> { %v954_v24 = vpop.f32.mrb[12].mxu1 }
 0x542   : >> { %v1004_v25 = vadd.f32 %v1003_v16, %v954_v24  ;;  %v1392_v26 = vpop.f32.mrb[13].mxu1 }
 0x543   : >> { %v957_v27 = vpop.f32.mrb[14].mxu1 }
 0x544   : >> { %v1393_v28 = vpop.f32.mrb[15].mxu1  ;;  %v1110_v31 = vadd.f32 %v1308_v29, %v1004_v25 }
 0x546   : >> { %v1119_v37 = vmax.f32 %v1110_v31, 0.0 }
 0x549   : >> { %v1051_v30 = vpop.f32.mrb[16].mxu1 }
 0x54a   : >> { %v1098_v32 = vadd.f32 %v1097_v20, %v1051_v30  ;;  %v1404_v33 = vpop.f32.mrb[17].mxu1 }
 0x54b   : >> { %v1054_v34 = vpop.f32.mrb[18].mxu1 }
 0x54c   : >> { %v1118_v35 = vadd.f32 %v1309_v1, %v1098_v32  ;;  %v1405_v36 = vpop.f32.mrb[19].mxu1  ;;  %481 = sbr.rel (!%p479_p7) target bundleno = 198 (0xc6), region = 138 }
 0x54e   : >> { %v1120_v38 = vmax.f32 %v1118_v35, 0.0 }
 0x550   : >> { %v1121_v39 = vmax.f32 %v1119_v37, %v1120_v38 }
 0x552   : >> { %1123 = vst.msk [vmem:[%s1122_s28] sm:$0xff] %vm510_vm1, %v1121_v39 }
 0x553   : > { %1729 = shalt.err (!%p1726_p6)
}
 0x554   : > { %s1730_s24 = scalar_lea.hbm %s2244_s2, 384  ;;  %s1734_s26 = scalar_lea.hbm %s2331_s22, 768 }
 0x555   : > { %p1731_p10 = scmp.ne.s32.totalorder %s2244_s2, %s1730_s24  ;;  %p1735_p5 = scmp.lt.u32.totalorder %s2244_s2, %s2331_s22 }
 0x556   : > { %p1736_p9 = scmp.lt.u32.totalorder %s1734_s26, %s1730_s24  ;;  %p1738_p4 = scmp.lt.u32.totalorder %s1730_s24, %s2244_s2 }
 0x557   : > { %p1732_p11 = pnand %p1731_p10, %p2332_p12 }
 0x558   : > { %p1737_p7 = por %p1736_p9, %p1735_p5 }
 0x559   : > { %p1733_p0 = pneg %p1732_p11 }
 0x55a   : > { %p1739_p13 = por %p1738_p4, %p1737_p7 }
 0x55c   : > { %p1740_p1 = pnand %p1739_p13, %p1733_p0 }
 0x55e   : > { %1743 = shalt.err (!%p1740_p1)
}
 0x55f   : > { %s1818_s30 = smov 128   ;;  %s1819_s10 = smov 8  }
 0x560   : > { %1436 = dma.vmem_to_hbm [thread:$0]  (%p2332_p12), %s2246_s11, 384, %s2244_s2, %s1125_s21, %s1818_s30, %s1818_s30, %s1819_s10  }
 0x561 PF: > { %s1153_s1 = sand.u32 1, %s1786_s17   ;;  %p2333_p3 = scmp.ne.s32.totalorder %s2320_s13, 0 }
 0x562   : > { %p2334_p2 = scmp.ge.s32.totalorder %s1798_s20, 2  ;;  %s1154_s23 = scalar_lea.sflag [#allocation4], %s1153_s1 }
 0x564   : > { %p1459_p8 = pnand %p2334_p2, %p2333_p3 }
 0x566   : > { %1781 = dma.done.wait (!%p1459_p8), %s1154_s23, 384  }
 0x567   : > { %1783 = vsyncadd (!%p1459_p8), %s1154_s23, 4294966912  ;;  %p27_p6 = scmp.ge.s32.totalorder %s2047_s27, 4   ;;  %s2335_s17 = smov %s1790_s18 }
 0x568   : > { %s2336_s18 = smov %s1794_s19  ;;  %s2337_s19 = smov %s2059_s9 }
 0x569   : > { %s2338_s20 = smov %s2047_s27  ;;  %29 = sbr.rel (!%p27_p6) target bundleno = 14 (0xe), region = 149 }
 0x570   :  { %1159 = vsyncpa [#allocation3], 1 }
 0x571   :  { %1161 = vsyncpa [#allocation3 + $0x1], 1 }
 0x572   :  { %1162 = vsyncpa [#allocation6], 1 }
 0x573   :  { %1163 = vsyncpa [#allocation9], 1 }
 0x574   :  { %1164 = vsyncpa [#allocation12], 1 }
 0x575   :  { %1165 = vsyncpa [#allocation4], 1 }
 0x576   :  { %1167 = vsyncpa [#allocation4 + $0x1], 1 }

</bundles_post_ra>
